<compile_context>
chip_gen: v7x
topology: tpu7x:2x2x1
jax: 0.10.0
libtpu: 0.0.40
codegen_flags: <defaults>
</compile_context>

<pallas_src>
import functools

import jax
import jax.numpy as jnp
import numpy as np
from jax import lax
from jax.experimental import pallas as pl
from jax.experimental.pallas import tpu as pltpu

# --- small hyper-parameters consistent with the module ---
CHANNELS = 32          # hp.channels
OUT_CHANNELS = 16      # hp.out_channels
KERNEL_SIZE = 3        # hp.dec_kernel_size
DEC_DILATIONS = (1, 2) # hp.dec_dilations
EPS = 1e-5             # BatchNorm eps
LANE = 128             # lane-group width everything is padded to

# 2 convs per ResidualBlock; res_blocks use DEC_DILATIONS, post_net2's block uses dilation 1.
N_CONV_BLOCKS = 2 * len(DEC_DILATIONS) + 2
# TODO(synk): hp.final_activation assumed torch.nn.Identity; FreqNorm running-stat
# (momentum) updates are a training-time side effect and are not emitted.


def _spec_decoder_kernel(x_ref, wres_ref, vres_ref, w1_ref, b1_ref, wf_ref, bf_ref,
                         o_ref, *, T):
    BT, C = x_ref.shape
    K = KERNEL_SIZE
    inv_n = 1.0 / BT
    x = x_ref[...]                                           # (B*T, C) f32, flat throughout

    # Hoisted once (JAX does not CSE broadcast_in_dim): per-row time index and the
    # ZeroTemporalPad keep-masks for every dilation that is actually used.
    t_idx = lax.broadcasted_iota(jnp.int32, (BT, C), 0) % T
    masks = {}
    for d in sorted(set(DEC_DILATIONS) | {1}):
        lo = d * (K - 1) // 2
        hi = T - (d * (K - 1) - lo)
        masks[d] = (t_idx >= lo) & (t_idx < hi)

    def freqnorm(y, gamma, beta):
        # One-pass BatchNorm1d stats over (batch,time): a single cross-sublane
        # reduction over the lane-concatenated [y | y*y]; biased variance.
        s = jnp.sum(jnp.concatenate([y, y * y], axis=1), axis=0, keepdims=True) * inv_n
        mu = s[:, :C]
        var = s[:, C:] - mu * mu
        return (y - mu) * lax.rsqrt(var + EPS) * gamma + beta

    def conv_block(y, m, d):
        # Conv1d(K, dilation=d, 'valid') -> ZeroTemporalPad -> ReLU -> FreqNorm.
        # im2col along the contraction dim: tap j of padded-output row r reads input
        # row r - lo + j*d, built with sublane rolls of the flat (B*T, C) activation.
        # Roll wrap-around / cross-batch rows only land on positions that the
        # ZeroTemporalPad mask zeroes anyway.
        lo = d * (K - 1) // 2
        cols = []
        for j in range(K):
            shift = (lo - j * d) % BT
            cols.append(pltpu.roll(y, shift, 0) if shift else y)
        cols.append(y)  # lane-pad K*C=96 -> 128; the matching weight rows are zero
        yk = jnp.concatenate(cols, axis=1)                   # (B*T, 4*C) = (B*T, 128)

        pv = vres_ref[m]                                     # (3, C): bias / gamma / beta
        z = jnp.dot(yk, wres_ref[m], preferred_element_type=jnp.float32) + pv[0:1, :]
        # ZeroTemporalPad + ReLU: edge rows (bias-contaminated / wrapped) forced to 0,
        # exactly matching pad-after-valid-conv.
        z = jnp.where(masks[d], jnp.maximum(z, 0.0), 0.0)
        return freqnorm(z, pv[1:2, :], pv[2:3, :])

    def residual_block(y, first, d):
        z = conv_block(y, first, d)
        z = conv_block(z, first + 1, d)
        return y + z

    # ---- res_blocks ----
    h = x
    for i, d in enumerate(DEC_DILATIONS):
        h = residual_block(h, 2 * i, d)

    # ---- post_net1 (k=1 pointwise conv) + residual with the ORIGINAL input ----
    h = jnp.dot(h, w1_ref[...], preferred_element_type=jnp.float32) + b1_ref[...] + x

    # ---- post_net2: ResidualBlock(dilation=1) -> Conv1d(C -> out) -> Identity ----
    h = residual_block(h, 2 * len(DEC_DILATIONS), 1)
    # Final weight/bias are zero-padded to 128 output lanes (lane-dense store);
    # the wrapper slices the first OUT_CHANNELS columns.
    o_ref[...] = (jnp.dot(h, wf_ref[...], preferred_element_type=jnp.float32)
                  + bf_ref[...]).astype(o_ref.dtype)


def spec_decoder_forward(x, packed_params):
    B, T, C = x.shape
    assert C == CHANNELS
    wres, vres, w1, b1, wf, bf = packed_params
    BT = B * T
    x2 = x.reshape(BT, C)                                    # host/XLA-side; kernel stays flat
    args = (x2, wres, vres, w1, b1, wf, bf)
    vmem = pl.BlockSpec(memory_space=pltpu.MemorySpace.VMEM)

    flops = (N_CONV_BLOCKS * 2 * BT * (4 * C) * C            # fused-tap convs (padded contraction)
             + 2 * BT * C * C                                # post_net1
             + 2 * BT * C * LANE)                            # padded final projection
    bytes_accessed = int(sum(int(a.size) * a.dtype.itemsize for a in args) + BT * LANE * 4)

    out2d = pl.pallas_call(
        functools.partial(_spec_decoder_kernel, T=T),
        out_shape=jax.ShapeDtypeStruct((BT, LANE), x.dtype),
        in_specs=[vmem] * len(args),
        out_specs=vmem,
        cost_estimate=pl.CostEstimate(flops=flops,
                                      transcendentals=N_CONV_BLOCKS * C,
                                      bytes_accessed=bytes_accessed),
    )(*args)
    # TODO(synk): for large B*T, grid over row tiles (parallel semantics, v7x 2-TC) with a
    # partial-sum + finalize FreqNorm; re-derive the tile for v7x's 64 MiB VMEM.
    return out2d[:, :OUT_CHANNELS].reshape(B, T, OUT_CHANNELS)


# ---------------- host-side parameter construction / packing ----------------

def init_params(key):
    """Parameters in PyTorch layout."""
    C, K, O, n = CHANNELS, KERNEL_SIZE, OUT_CHANNELS, N_CONV_BLOCKS
    ks = jax.random.split(key, 8)
    s = 0.1
    conv_w = jax.random.normal(ks[0], (n, C, C, K), jnp.float32) * s   # (out, in, k) per block
    conv_b = jax.random.normal(ks[1], (n, C), jnp.float32) * s
    gamma = 1.0 + jax.random.normal(ks[2], (n, C), jnp.float32) * s    # FreqNorm affine
    beta = jax.random.normal(ks[3], (n, C), jnp.float32) * s
    pn1_w = jax.random.normal(ks[4], (C, C), jnp.float32) * s          # post_net1 k=1 conv (out,in)
    pn1_b = jax.random.normal(ks[5], (C,), jnp.float32) * s
    fin_w = jax.random.normal(ks[6], (O, C), jnp.float32) * s          # final k=1 conv (out,in)
    fin_b = jax.random.normal(ks[7], (O,), jnp.float32) * s
    return (conv_w, conv_b, gamma, beta, pn1_w, pn1_b, fin_w, fin_b)


def pack_params(params):
    """Host-side repack: im2col conv weights (pre-transposed, taps stacked on the
    contraction dim, zero-padded 96->128 rows), slabbed per-block vectors, and a
    lane-dense (128-wide) final projection."""
    conv_w, conv_b, gamma, beta, pn1_w, pn1_b, fin_w, fin_b = params
    n, C, _, K = conv_w.shape
    assert (K + 1) * C == LANE, "lane-padding trick assumes (K+1)*C == 128"
    # rows j*C:(j+1)*C hold tap j as (in, out); rows K*C:LANE are zero so the
    # duplicated activation column block appended in-kernel contributes nothing.
    wres = jnp.concatenate(
        [jnp.transpose(conv_w[:, :, :, j], (0, 2, 1)) for j in range(K)]
        + [jnp.zeros((n, C, C), jnp.float32)], axis=1)                 # (n, LANE, C)
    vres = jnp.stack([conv_b, gamma, beta], axis=1)                    # (n, 3, C)
    O = fin_w.shape[0]
    wf = jnp.zeros((C, LANE), jnp.float32).at[:, :O].set(fin_w.T)      # lane-dense output
    bf = jnp.zeros((1, LANE), jnp.float32).at[:, :O].set(fin_b)
    return (wres, vres, pn1_w.T, pn1_b[None, :], wf, bf)


# ---------------- pure-JAX reference (mirrors the PyTorch module) ----------------

def spec_decoder_reference(x, params):
    conv_w, conv_b, gamma, beta, pn1_w, pn1_b, fin_w, fin_b = params
    B, T, C = x.shape
    K = KERNEL_SIZE

    def freqnorm(y, g, b):
        mu = y.mean(axis=(0, 1), keepdims=True)
        var = ((y - mu) ** 2).mean(axis=(0, 1), keepdims=True)
        return (y - mu) / jnp.sqrt(var + EPS) * g + b

    def conv_block(y, m, d):
        t_out = T - d * (K - 1)
        out = sum(jnp.einsum('btc,oc->bto', y[:, j * d:j * d + t_out, :], conv_w[m, :, :, j])
                  for j in range(K)) + conv_b[m]
        begin = (d * (K - 1)) // 2
        end = d * (K - 1) - begin
        out = jnp.pad(out, ((0, 0), (begin, end), (0, 0)))
        out = jax.nn.relu(out)
        return freqnorm(out, gamma[m], beta[m])

    def residual_block(y, first, d):
        z = conv_block(y, first, d)
        z = conv_block(z, first + 1, d)
        return y + z

    h = x
    for i, d in enumerate(DEC_DILATIONS):
        h = residual_block(h, 2 * i, d)
    h2 = jnp.einsum('btc,oc->bto', h, pn1_w) + pn1_b
    h2 = h2 + x
    h2 = residual_block(h2, 2 * len(DEC_DILATIONS), 1)
    out = jnp.einsum('btc,oc->bto', h2, fin_w) + fin_b
    return out        # final_activation = Identity


if __name__ == "__main__":
    B, T = 2, 16
    key = jax.random.PRNGKey(0)
    kx, kp = jax.random.split(key)
    x = jax.random.normal(kx, (B, T, CHANNELS), jnp.float32)

    torch_layout_params = init_params(kp)
    packed = pack_params(torch_layout_params)

    out = spec_decoder_forward(x, packed)
    out = jax.block_until_ready(out)

    ref = spec_decoder_reference(x, torch_layout_params)
    np.testing.assert_allclose(np.asarray(out), np.asarray(ref), rtol=5e-3, atol=5e-3)

    print("KERNEL_OK")
</pallas_src>

<mosaic_0001>
module attributes {stable_mosaic.version = 11 : i64} {
  func.func @_spec_decoder_kernel(%arg0: memref<32x32xf32, #tpu.memory_space<vmem>>, %arg1: memref<6x128x32xf32, #tpu.memory_space<vmem>>, %arg2: memref<6x3x32xf32, #tpu.memory_space<vmem>>, %arg3: memref<32x32xf32, #tpu.memory_space<vmem>>, %arg4: memref<1x32xf32, #tpu.memory_space<vmem>>, %arg5: memref<32x128xf32, #tpu.memory_space<vmem>>, %arg6: memref<1x128xf32, #tpu.memory_space<vmem>>, %arg7: memref<32x128xf32, #tpu.memory_space<vmem>>) attributes {dimension_semantics = [], scalar_prefetch = 0 : i64, scratch_operands = 0 : i64, tpu.core_type = #tpu.core_type<tc>} {
    %c0 = arith.constant 0 : index
    %c0_0 = arith.constant 0 : index
    %0 = vector.load %arg0[%c0, %c0_0] : memref<32x32xf32, #tpu.memory_space<vmem>>, vector<32x32xf32>
    %1 = tpu.iota {dimensions = array<i32: 0>} : vector<32x32xi32>
    %c16_i32 = arith.constant 16 : i32
    %c0_i32 = arith.constant 0 : i32
    %2 = arith.cmpi eq, %c16_i32, %c0_i32 : i32
    %c1_i32 = arith.constant 1 : i32
    %3 = arith.select %2, %c1_i32, %c16_i32 : i32
    %4 = vector.broadcast %3 : i32 to vector<32x32xi32>
    %5 = arith.remsi %1, %4 : vector<32x32xi32>
    %c0_i32_1 = arith.constant 0 : i32
    %6 = vector.broadcast %c0_i32_1 : i32 to vector<32x32xi32>
    %7 = arith.cmpi ne, %5, %6 : vector<32x32xi32>
    %c0_i32_2 = arith.constant 0 : i32
    %8 = vector.broadcast %c0_i32_2 : i32 to vector<32x32xi32>
    %9 = arith.cmpi slt, %5, %8 : vector<32x32xi32>
    %c0_i32_3 = arith.constant 0 : i32
    %10 = arith.cmpi slt, %3, %c0_i32_3 : i32
    %11 = vector.broadcast %10 : i1 to vector<32x32xi1>
    %12 = vector.broadcast %11 : vector<32x32xi1> to vector<32x32xi1>
    %13 = arith.xori %9, %12 : vector<32x32xi1>
    %14 = arith.andi %13, %7 : vector<32x32xi1>
    %15 = vector.broadcast %3 : i32 to vector<32x32xi32>
    %16 = arith.addi %5, %15 : vector<32x32xi32>
    %17 = arith.select %14, %16, %5 : vector<32x32xi1>, vector<32x32xi32>
    %c1_i32_4 = arith.constant 1 : i32
    %18 = vector.broadcast %c1_i32_4 : i32 to vector<32x32xi32>
    %19 = arith.cmpi sge, %17, %18 : vector<32x32xi32>
    %c15_i32 = arith.constant 15 : i32
    %20 = vector.broadcast %c15_i32 : i32 to vector<32x32xi32>
    %21 = arith.cmpi slt, %17, %20 : vector<32x32xi32>
    %22 = arith.andi %19, %21 : vector<32x32xi1>
    %c2_i32 = arith.constant 2 : i32
    %23 = vector.broadcast %c2_i32 : i32 to vector<32x32xi32>
    %24 = arith.cmpi sge, %17, %23 : vector<32x32xi32>
    %c14_i32 = arith.constant 14 : i32
    %25 = vector.broadcast %c14_i32 : i32 to vector<32x32xi32>
    %26 = arith.cmpi slt, %17, %25 : vector<32x32xi32>
    %27 = arith.andi %24, %26 : vector<32x32xi1>
    %c1_i32_5 = arith.constant 1 : i32
    %28 = tpu.dynamic_rotate %0 by %c1_i32_5 dim 0 : vector<32x32xf32>, i32 -> vector<32x32xf32>
    %c31_i32 = arith.constant 31 : i32
    %29 = tpu.dynamic_rotate %0 by %c31_i32 dim 0 : vector<32x32xf32>, i32 -> vector<32x32xf32>
    %30 = tpu.concatenate %28, %0, %29, %0 in 1 : vector<32x32xf32>, vector<32x32xf32>, vector<32x32xf32>, vector<32x32xf32> -> vector<32x128xf32>
    %c0_6 = arith.constant 0 : index
    %c0_7 = arith.constant 0 : index
    %c0_8 = arith.constant 0 : index
    %31 = vector.load %arg2[%c0_6, %c0_7, %c0_8] : memref<6x3x32xf32, #tpu.memory_space<vmem>>, vector<1x3x32xf32>
    %32 = vector.shape_cast %31 : vector<1x3x32xf32> to vector<3x32xf32>
    %c0_9 = arith.constant 0 : index
    %c0_10 = arith.constant 0 : index
    %c0_11 = arith.constant 0 : index
    %33 = vector.load %arg1[%c0_9, %c0_10, %c0_11] : memref<6x128x32xf32, #tpu.memory_space<vmem>>, vector<1x128x32xf32>
    %34 = vector.shape_cast %33 : vector<1x128x32xf32> to vector<128x32xf32>
    %cst = arith.constant dense<0.000000e+00> : vector<32x32xf32>
    %35 = tpu.matmul %30, %34, %cst {dimension_numbers = #tpu.dot_dimension_numbers<[1], [0], [0], [1], [0, 0, 1, 1], [], []>} : vector<32x128xf32>, vector<128x32xf32>, vector<32x32xf32> -> vector<32x32xf32>
    %36 = vector.extract_strided_slice %32 {offsets = [0, 0], sizes = [1, 32], strides = [1, 1]} : vector<3x32xf32> to vector<1x32xf32>
    %37 = vector.broadcast %36 : vector<1x32xf32> to vector<32x32xf32>
    %38 = arith.addf %35, %37 : vector<32x32xf32>
    %cst_12 = arith.constant 0.000000e+00 : f32
    %39 = vector.broadcast %cst_12 : f32 to vector<32x32xf32>
    %40 = arith.maximumf %38, %39 : vector<32x32xf32>
    %cst_13 = arith.constant 0.000000e+00 : f32
    %41 = vector.broadcast %cst_13 : f32 to vector<32x32xf32>
    %42 = arith.select %22, %40, %41 : vector<32x32xi1>, vector<32x32xf32>
    %43 = vector.extract_strided_slice %32 {offsets = [1, 0], sizes = [1, 32], strides = [1, 1]} : vector<3x32xf32> to vector<1x32xf32>
    %44 = vector.extract_strided_slice %32 {offsets = [2, 0], sizes = [1, 32], strides = [1, 1]} : vector<3x32xf32> to vector<1x32xf32>
    %45 = arith.mulf %42, %42 : vector<32x32xf32>
    %46 = tpu.concatenate %42, %45 in 1 : vector<32x32xf32>, vector<32x32xf32> -> vector<32x64xf32>
    %cst_14 = arith.constant dense<0.000000e+00> : vector<64xf32>
    %47 = vector.multi_reduction <add>, %46, %cst_14 [0] : vector<32x64xf32> to vector<64xf32>
    %48 = vector.shape_cast %47 : vector<64xf32> to vector<1x64xf32>
    %cst_15 = arith.constant 3.125000e-02 : f32
    %49 = vector.broadcast %cst_15 : f32 to vector<1x64xf32>
    %50 = arith.mulf %48, %49 : vector<1x64xf32>
    %51 = vector.extract_strided_slice %50 {offsets = [0, 0], sizes = [1, 32], strides = [1, 1]} : vector<1x64xf32> to vector<1x32xf32>
    %52 = vector.extract_strided_slice %50 {offsets = [0, 32], sizes = [1, 32], strides = [1, 1]} : vector<1x64xf32> to vector<1x32xf32>
    %53 = arith.mulf %51, %51 : vector<1x32xf32>
    %54 = arith.subf %52, %53 : vector<1x32xf32>
    %55 = vector.broadcast %51 : vector<1x32xf32> to vector<32x32xf32>
    %56 = arith.subf %42, %55 : vector<32x32xf32>
    %cst_16 = arith.constant 9.99999974E-6 : f32
    %57 = vector.broadcast %cst_16 : f32 to vector<1x32xf32>
    %58 = arith.addf %54, %57 : vector<1x32xf32>
    %59 = math.rsqrt %58 : vector<1x32xf32>
    %60 = vector.broadcast %59 : vector<1x32xf32> to vector<32x32xf32>
    %61 = arith.mulf %56, %60 : vector<32x32xf32>
    %62 = vector.broadcast %43 : vector<1x32xf32> to vector<32x32xf32>
    %63 = arith.mulf %61, %62 : vector<32x32xf32>
    %64 = vector.broadcast %44 : vector<1x32xf32> to vector<32x32xf32>
    %65 = arith.addf %63, %64 : vector<32x32xf32>
    %c1_i32_17 = arith.constant 1 : i32
    %66 = tpu.dynamic_rotate %65 by %c1_i32_17 dim 0 : vector<32x32xf32>, i32 -> vector<32x32xf32>
    %c31_i32_18 = arith.constant 31 : i32
    %67 = tpu.dynamic_rotate %65 by %c31_i32_18 dim 0 : vector<32x32xf32>, i32 -> vector<32x32xf32>
    %68 = tpu.concatenate %66, %65, %67, %65 in 1 : vector<32x32xf32>, vector<32x32xf32>, vector<32x32xf32>, vector<32x32xf32> -> vector<32x128xf32>
    %c1 = arith.constant 1 : index
    %c0_19 = arith.constant 0 : index
    %c0_20 = arith.constant 0 : index
    %69 = vector.load %arg2[%c1, %c0_19, %c0_20] : memref<6x3x32xf32, #tpu.memory_space<vmem>>, vector<1x3x32xf32>
    %70 = vector.shape_cast %69 : vector<1x3x32xf32> to vector<3x32xf32>
    %c1_21 = arith.constant 1 : index
    %c0_22 = arith.constant 0 : index
    %c0_23 = arith.constant 0 : index
    %71 = vector.load %arg1[%c1_21, %c0_22, %c0_23] : memref<6x128x32xf32, #tpu.memory_space<vmem>>, vector<1x128x32xf32>
    %72 = vector.shape_cast %71 : vector<1x128x32xf32> to vector<128x32xf32>
    %cst_24 = arith.constant dense<0.000000e+00> : vector<32x32xf32>
    %73 = tpu.matmul %68, %72, %cst_24 {dimension_numbers = #tpu.dot_dimension_numbers<[1], [0], [0], [1], [0, 0, 1, 1], [], []>} : vector<32x128xf32>, vector<128x32xf32>, vector<32x32xf32> -> vector<32x32xf32>
    %74 = vector.extract_strided_slice %70 {offsets = [0, 0], sizes = [1, 32], strides = [1, 1]} : vector<3x32xf32> to vector<1x32xf32>
    %75 = vector.broadcast %74 : vector<1x32xf32> to vector<32x32xf32>
    %76 = arith.addf %73, %75 : vector<32x32xf32>
    %cst_25 = arith.constant 0.000000e+00 : f32
    %77 = vector.broadcast %cst_25 : f32 to vector<32x32xf32>
    %78 = arith.maximumf %76, %77 : vector<32x32xf32>
    %cst_26 = arith.constant 0.000000e+00 : f32
    %79 = vector.broadcast %cst_26 : f32 to vector<32x32xf32>
    %80 = arith.select %22, %78, %79 : vector<32x32xi1>, vector<32x32xf32>
    %81 = vector.extract_strided_slice %70 {offsets = [1, 0], sizes = [1, 32], strides = [1, 1]} : vector<3x32xf32> to vector<1x32xf32>
    %82 = vector.extract_strided_slice %70 {offsets = [2, 0], sizes = [1, 32], strides = [1, 1]} : vector<3x32xf32> to vector<1x32xf32>
    %83 = arith.mulf %80, %80 : vector<32x32xf32>
    %84 = tpu.concatenate %80, %83 in 1 : vector<32x32xf32>, vector<32x32xf32> -> vector<32x64xf32>
    %cst_27 = arith.constant dense<0.000000e+00> : vector<64xf32>
    %85 = vector.multi_reduction <add>, %84, %cst_27 [0] : vector<32x64xf32> to vector<64xf32>
    %86 = vector.shape_cast %85 : vector<64xf32> to vector<1x64xf32>
    %cst_28 = arith.constant 3.125000e-02 : f32
    %87 = vector.broadcast %cst_28 : f32 to vector<1x64xf32>
    %88 = arith.mulf %86, %87 : vector<1x64xf32>
    %89 = vector.extract_strided_slice %88 {offsets = [0, 0], sizes = [1, 32], strides = [1, 1]} : vector<1x64xf32> to vector<1x32xf32>
    %90 = vector.extract_strided_slice %88 {offsets = [0, 32], sizes = [1, 32], strides = [1, 1]} : vector<1x64xf32> to vector<1x32xf32>
    %91 = arith.mulf %89, %89 : vector<1x32xf32>
    %92 = arith.subf %90, %91 : vector<1x32xf32>
    %93 = vector.broadcast %89 : vector<1x32xf32> to vector<32x32xf32>
    %94 = arith.subf %80, %93 : vector<32x32xf32>
    %cst_29 = arith.constant 9.99999974E-6 : f32
    %95 = vector.broadcast %cst_29 : f32 to vector<1x32xf32>
    %96 = arith.addf %92, %95 : vector<1x32xf32>
    %97 = math.rsqrt %96 : vector<1x32xf32>
    %98 = vector.broadcast %97 : vector<1x32xf32> to vector<32x32xf32>
    %99 = arith.mulf %94, %98 : vector<32x32xf32>
    %100 = vector.broadcast %81 : vector<1x32xf32> to vector<32x32xf32>
    %101 = arith.mulf %99, %100 : vector<32x32xf32>
    %102 = vector.broadcast %82 : vector<1x32xf32> to vector<32x32xf32>
    %103 = arith.addf %101, %102 : vector<32x32xf32>
    %104 = arith.addf %0, %103 : vector<32x32xf32>
    %c2_i32_30 = arith.constant 2 : i32
    %105 = tpu.dynamic_rotate %104 by %c2_i32_30 dim 0 : vector<32x32xf32>, i32 -> vector<32x32xf32>
    %c30_i32 = arith.constant 30 : i32
    %106 = tpu.dynamic_rotate %104 by %c30_i32 dim 0 : vector<32x32xf32>, i32 -> vector<32x32xf32>
    %107 = tpu.concatenate %105, %104, %106, %104 in 1 : vector<32x32xf32>, vector<32x32xf32>, vector<32x32xf32>, vector<32x32xf32> -> vector<32x128xf32>
    %c2 = arith.constant 2 : index
    %c0_31 = arith.constant 0 : index
    %c0_32 = arith.constant 0 : index
    %108 = vector.load %arg2[%c2, %c0_31, %c0_32] : memref<6x3x32xf32, #tpu.memory_space<vmem>>, vector<1x3x32xf32>
    %109 = vector.shape_cast %108 : vector<1x3x32xf32> to vector<3x32xf32>
    %c2_33 = arith.constant 2 : index
    %c0_34 = arith.constant 0 : index
    %c0_35 = arith.constant 0 : index
    %110 = vector.load %arg1[%c2_33, %c0_34, %c0_35] : memref<6x128x32xf32, #tpu.memory_space<vmem>>, vector<1x128x32xf32>
    %111 = vector.shape_cast %110 : vector<1x128x32xf32> to vector<128x32xf32>
    %cst_36 = arith.constant dense<0.000000e+00> : vector<32x32xf32>
    %112 = tpu.matmul %107, %111, %cst_36 {dimension_numbers = #tpu.dot_dimension_numbers<[1], [0], [0], [1], [0, 0, 1, 1], [], []>} : vector<32x128xf32>, vector<128x32xf32>, vector<32x32xf32> -> vector<32x32xf32>
    %113 = vector.extract_strided_slice %109 {offsets = [0, 0], sizes = [1, 32], strides = [1, 1]} : vector<3x32xf32> to vector<1x32xf32>
    %114 = vector.broadcast %113 : vector<1x32xf32> to vector<32x32xf32>
    %115 = arith.addf %112, %114 : vector<32x32xf32>
    %cst_37 = arith.constant 0.000000e+00 : f32
    %116 = vector.broadcast %cst_37 : f32 to vector<32x32xf32>
    %117 = arith.maximumf %115, %116 : vector<32x32xf32>
    %cst_38 = arith.constant 0.000000e+00 : f32
    %118 = vector.broadcast %cst_38 : f32 to vector<32x32xf32>
    %119 = arith.select %27, %117, %118 : vector<32x32xi1>, vector<32x32xf32>
    %120 = vector.extract_strided_slice %109 {offsets = [1, 0], sizes = [1, 32], strides = [1, 1]} : vector<3x32xf32> to vector<1x32xf32>
    %121 = vector.extract_strided_slice %109 {offsets = [2, 0], sizes = [1, 32], strides = [1, 1]} : vector<3x32xf32> to vector<1x32xf32>
    %122 = arith.mulf %119, %119 : vector<32x32xf32>
    %123 = tpu.concatenate %119, %122 in 1 : vector<32x32xf32>, vector<32x32xf32> -> vector<32x64xf32>
    %cst_39 = arith.constant dense<0.000000e+00> : vector<64xf32>
    %124 = vector.multi_reduction <add>, %123, %cst_39 [0] : vector<32x64xf32> to vector<64xf32>
    %125 = vector.shape_cast %124 : vector<64xf32> to vector<1x64xf32>
    %cst_40 = arith.constant 3.125000e-02 : f32
    %126 = vector.broadcast %cst_40 : f32 to vector<1x64xf32>
    %127 = arith.mulf %125, %126 : vector<1x64xf32>
    %128 = vector.extract_strided_slice %127 {offsets = [0, 0], sizes = [1, 32], strides = [1, 1]} : vector<1x64xf32> to vector<1x32xf32>
    %129 = vector.extract_strided_slice %127 {offsets = [0, 32], sizes = [1, 32], strides = [1, 1]} : vector<1x64xf32> to vector<1x32xf32>
    %130 = arith.mulf %128, %128 : vector<1x32xf32>
    %131 = arith.subf %129, %130 : vector<1x32xf32>
    %132 = vector.broadcast %128 : vector<1x32xf32> to vector<32x32xf32>
    %133 = arith.subf %119, %132 : vector<32x32xf32>
    %cst_41 = arith.constant 9.99999974E-6 : f32
    %134 = vector.broadcast %cst_41 : f32 to vector<1x32xf32>
    %135 = arith.addf %131, %134 : vector<1x32xf32>
    %136 = math.rsqrt %135 : vector<1x32xf32>
    %137 = vector.broadcast %136 : vector<1x32xf32> to vector<32x32xf32>
    %138 = arith.mulf %133, %137 : vector<32x32xf32>
    %139 = vector.broadcast %120 : vector<1x32xf32> to vector<32x32xf32>
    %140 = arith.mulf %138, %139 : vector<32x32xf32>
    %141 = vector.broadcast %121 : vector<1x32xf32> to vector<32x32xf32>
    %142 = arith.addf %140, %141 : vector<32x32xf32>
    %c2_i32_42 = arith.constant 2 : i32
    %143 = tpu.dynamic_rotate %142 by %c2_i32_42 dim 0 : vector<32x32xf32>, i32 -> vector<32x32xf32>
    %c30_i32_43 = arith.constant 30 : i32
    %144 = tpu.dynamic_rotate %142 by %c30_i32_43 dim 0 : vector<32x32xf32>, i32 -> vector<32x32xf32>
    %145 = tpu.concatenate %143, %142, %144, %142 in 1 : vector<32x32xf32>, vector<32x32xf32>, vector<32x32xf32>, vector<32x32xf32> -> vector<32x128xf32>
    %c3 = arith.constant 3 : index
    %c0_44 = arith.constant 0 : index
    %c0_45 = arith.constant 0 : index
    %146 = vector.load %arg2[%c3, %c0_44, %c0_45] : memref<6x3x32xf32, #tpu.memory_space<vmem>>, vector<1x3x32xf32>
    %147 = vector.shape_cast %146 : vector<1x3x32xf32> to vector<3x32xf32>
    %c3_46 = arith.constant 3 : index
    %c0_47 = arith.constant 0 : index
    %c0_48 = arith.constant 0 : index
    %148 = vector.load %arg1[%c3_46, %c0_47, %c0_48] : memref<6x128x32xf32, #tpu.memory_space<vmem>>, vector<1x128x32xf32>
    %149 = vector.shape_cast %148 : vector<1x128x32xf32> to vector<128x32xf32>
    %cst_49 = arith.constant dense<0.000000e+00> : vector<32x32xf32>
    %150 = tpu.matmul %145, %149, %cst_49 {dimension_numbers = #tpu.dot_dimension_numbers<[1], [0], [0], [1], [0, 0, 1, 1], [], []>} : vector<32x128xf32>, vector<128x32xf32>, vector<32x32xf32> -> vector<32x32xf32>
    %151 = vector.extract_strided_slice %147 {offsets = [0, 0], sizes = [1, 32], strides = [1, 1]} : vector<3x32xf32> to vector<1x32xf32>
    %152 = vector.broadcast %151 : vector<1x32xf32> to vector<32x32xf32>
    %153 = arith.addf %150, %152 : vector<32x32xf32>
    %cst_50 = arith.constant 0.000000e+00 : f32
    %154 = vector.broadcast %cst_50 : f32 to vector<32x32xf32>
    %155 = arith.maximumf %153, %154 : vector<32x32xf32>
    %cst_51 = arith.constant 0.000000e+00 : f32
    %156 = vector.broadcast %cst_51 : f32 to vector<32x32xf32>
    %157 = arith.select %27, %155, %156 : vector<32x32xi1>, vector<32x32xf32>
    %158 = vector.extract_strided_slice %147 {offsets = [1, 0], sizes = [1, 32], strides = [1, 1]} : vector<3x32xf32> to vector<1x32xf32>
    %159 = vector.extract_strided_slice %147 {offsets = [2, 0], sizes = [1, 32], strides = [1, 1]} : vector<3x32xf32> to vector<1x32xf32>
    %160 = arith.mulf %157, %157 : vector<32x32xf32>
    %161 = tpu.concatenate %157, %160 in 1 : vector<32x32xf32>, vector<32x32xf32> -> vector<32x64xf32>
    %cst_52 = arith.constant dense<0.000000e+00> : vector<64xf32>
    %162 = vector.multi_reduction <add>, %161, %cst_52 [0] : vector<32x64xf32> to vector<64xf32>
    %163 = vector.shape_cast %162 : vector<64xf32> to vector<1x64xf32>
    %cst_53 = arith.constant 3.125000e-02 : f32
    %164 = vector.broadcast %cst_53 : f32 to vector<1x64xf32>
    %165 = arith.mulf %163, %164 : vector<1x64xf32>
    %166 = vector.extract_strided_slice %165 {offsets = [0, 0], sizes = [1, 32], strides = [1, 1]} : vector<1x64xf32> to vector<1x32xf32>
    %167 = vector.extract_strided_slice %165 {offsets = [0, 32], sizes = [1, 32], strides = [1, 1]} : vector<1x64xf32> to vector<1x32xf32>
    %168 = arith.mulf %166, %166 : vector<1x32xf32>
    %169 = arith.subf %167, %168 : vector<1x32xf32>
    %170 = vector.broadcast %166 : vector<1x32xf32> to vector<32x32xf32>
    %171 = arith.subf %157, %170 : vector<32x32xf32>
    %cst_54 = arith.constant 9.99999974E-6 : f32
    %172 = vector.broadcast %cst_54 : f32 to vector<1x32xf32>
    %173 = arith.addf %169, %172 : vector<1x32xf32>
    %174 = math.rsqrt %173 : vector<1x32xf32>
    %175 = vector.broadcast %174 : vector<1x32xf32> to vector<32x32xf32>
    %176 = arith.mulf %171, %175 : vector<32x32xf32>
    %177 = vector.broadcast %158 : vector<1x32xf32> to vector<32x32xf32>
    %178 = arith.mulf %176, %177 : vector<32x32xf32>
    %179 = vector.broadcast %159 : vector<1x32xf32> to vector<32x32xf32>
    %180 = arith.addf %178, %179 : vector<32x32xf32>
    %181 = arith.addf %104, %180 : vector<32x32xf32>
    %c0_55 = arith.constant 0 : index
    %c0_56 = arith.constant 0 : index
    %182 = vector.load %arg3[%c0_55, %c0_56] : memref<32x32xf32, #tpu.memory_space<vmem>>, vector<32x32xf32>
    %cst_57 = arith.constant dense<0.000000e+00> : vector<32x32xf32>
    %183 = tpu.matmul %181, %182, %cst_57 {dimension_numbers = #tpu.dot_dimension_numbers<[1], [0], [0], [1], [0, 0, 1, 1], [], []>} : vector<32x32xf32>, vector<32x32xf32>, vector<32x32xf32> -> vector<32x32xf32>
    %c0_58 = arith.constant 0 : index
    %c0_59 = arith.constant 0 : index
    %184 = vector.load %arg4[%c0_58, %c0_59] : memref<1x32xf32, #tpu.memory_space<vmem>>, vector<1x32xf32>
    %185 = vector.broadcast %184 : vector<1x32xf32> to vector<32x32xf32>
    %186 = arith.addf %183, %185 : vector<32x32xf32>
    %187 = arith.addf %186, %0 : vector<32x32xf32>
    %c1_i32_60 = arith.constant 1 : i32
    %188 = tpu.dynamic_rotate %187 by %c1_i32_60 dim 0 : vector<32x32xf32>, i32 -> vector<32x32xf32>
    %c31_i32_61 = arith.constant 31 : i32
    %189 = tpu.dynamic_rotate %187 by %c31_i32_61 dim 0 : vector<32x32xf32>, i32 -> vector<32x32xf32>
    %190 = tpu.concatenate %188, %187, %189, %187 in 1 : vector<32x32xf32>, vector<32x32xf32>, vector<32x32xf32>, vector<32x32xf32> -> vector<32x128xf32>
    %c4 = arith.constant 4 : index
    %c0_62 = arith.constant 0 : index
    %c0_63 = arith.constant 0 : index
    %191 = vector.load %arg2[%c4, %c0_62, %c0_63] : memref<6x3x32xf32, #tpu.memory_space<vmem>>, vector<1x3x32xf32>
    %192 = vector.shape_cast %191 : vector<1x3x32xf32> to vector<3x32xf32>
    %c4_64 = arith.constant 4 : index
    %c0_65 = arith.constant 0 : index
    %c0_66 = arith.constant 0 : index
    %193 = vector.load %arg1[%c4_64, %c0_65, %c0_66] : memref<6x128x32xf32, #tpu.memory_space<vmem>>, vector<1x128x32xf32>
    %194 = vector.shape_cast %193 : vector<1x128x32xf32> to vector<128x32xf32>
    %cst_67 = arith.constant dense<0.000000e+00> : vector<32x32xf32>
    %195 = tpu.matmul %190, %194, %cst_67 {dimension_numbers = #tpu.dot_dimension_numbers<[1], [0], [0], [1], [0, 0, 1, 1], [], []>} : vector<32x128xf32>, vector<128x32xf32>, vector<32x32xf32> -> vector<32x32xf32>
    %196 = vector.extract_strided_slice %192 {offsets = [0, 0], sizes = [1, 32], strides = [1, 1]} : vector<3x32xf32> to vector<1x32xf32>
    %197 = vector.broadcast %196 : vector<1x32xf32> to vector<32x32xf32>
    %198 = arith.addf %195, %197 : vector<32x32xf32>
    %cst_68 = arith.constant 0.000000e+00 : f32
    %199 = vector.broadcast %cst_68 : f32 to vector<32x32xf32>
    %200 = arith.maximumf %198, %199 : vector<32x32xf32>
    %cst_69 = arith.constant 0.000000e+00 : f32
    %201 = vector.broadcast %cst_69 : f32 to vector<32x32xf32>
    %202 = arith.select %22, %200, %201 : vector<32x32xi1>, vector<32x32xf32>
    %203 = vector.extract_strided_slice %192 {offsets = [1, 0], sizes = [1, 32], strides = [1, 1]} : vector<3x32xf32> to vector<1x32xf32>
    %204 = vector.extract_strided_slice %192 {offsets = [2, 0], sizes = [1, 32], strides = [1, 1]} : vector<3x32xf32> to vector<1x32xf32>
    %205 = arith.mulf %202, %202 : vector<32x32xf32>
    %206 = tpu.concatenate %202, %205 in 1 : vector<32x32xf32>, vector<32x32xf32> -> vector<32x64xf32>
    %cst_70 = arith.constant dense<0.000000e+00> : vector<64xf32>
    %207 = vector.multi_reduction <add>, %206, %cst_70 [0] : vector<32x64xf32> to vector<64xf32>
    %208 = vector.shape_cast %207 : vector<64xf32> to vector<1x64xf32>
    %cst_71 = arith.constant 3.125000e-02 : f32
    %209 = vector.broadcast %cst_71 : f32 to vector<1x64xf32>
    %210 = arith.mulf %208, %209 : vector<1x64xf32>
    %211 = vector.extract_strided_slice %210 {offsets = [0, 0], sizes = [1, 32], strides = [1, 1]} : vector<1x64xf32> to vector<1x32xf32>
    %212 = vector.extract_strided_slice %210 {offsets = [0, 32], sizes = [1, 32], strides = [1, 1]} : vector<1x64xf32> to vector<1x32xf32>
    %213 = arith.mulf %211, %211 : vector<1x32xf32>
    %214 = arith.subf %212, %213 : vector<1x32xf32>
    %215 = vector.broadcast %211 : vector<1x32xf32> to vector<32x32xf32>
    %216 = arith.subf %202, %215 : vector<32x32xf32>
    %cst_72 = arith.constant 9.99999974E-6 : f32
    %217 = vector.broadcast %cst_72 : f32 to vector<1x32xf32>
    %218 = arith.addf %214, %217 : vector<1x32xf32>
    %219 = math.rsqrt %218 : vector<1x32xf32>
    %220 = vector.broadcast %219 : vector<1x32xf32> to vector<32x32xf32>
    %221 = arith.mulf %216, %220 : vector<32x32xf32>
    %222 = vector.broadcast %203 : vector<1x32xf32> to vector<32x32xf32>
    %223 = arith.mulf %221, %222 : vector<32x32xf32>
    %224 = vector.broadcast %204 : vector<1x32xf32> to vector<32x32xf32>
    %225 = arith.addf %223, %224 : vector<32x32xf32>
    %c1_i32_73 = arith.constant 1 : i32
    %226 = tpu.dynamic_rotate %225 by %c1_i32_73 dim 0 : vector<32x32xf32>, i32 -> vector<32x32xf32>
    %c31_i32_74 = arith.constant 31 : i32
    %227 = tpu.dynamic_rotate %225 by %c31_i32_74 dim 0 : vector<32x32xf32>, i32 -> vector<32x32xf32>
    %228 = tpu.concatenate %226, %225, %227, %225 in 1 : vector<32x32xf32>, vector<32x32xf32>, vector<32x32xf32>, vector<32x32xf32> -> vector<32x128xf32>
    %c5 = arith.constant 5 : index
    %c0_75 = arith.constant 0 : index
    %c0_76 = arith.constant 0 : index
    %229 = vector.load %arg2[%c5, %c0_75, %c0_76] : memref<6x3x32xf32, #tpu.memory_space<vmem>>, vector<1x3x32xf32>
    %230 = vector.shape_cast %229 : vector<1x3x32xf32> to vector<3x32xf32>
    %c5_77 = arith.constant 5 : index
    %c0_78 = arith.constant 0 : index
    %c0_79 = arith.constant 0 : index
    %231 = vector.load %arg1[%c5_77, %c0_78, %c0_79] : memref<6x128x32xf32, #tpu.memory_space<vmem>>, vector<1x128x32xf32>
    %232 = vector.shape_cast %231 : vector<1x128x32xf32> to vector<128x32xf32>
    %cst_80 = arith.constant dense<0.000000e+00> : vector<32x32xf32>
    %233 = tpu.matmul %228, %232, %cst_80 {dimension_numbers = #tpu.dot_dimension_numbers<[1], [0], [0], [1], [0, 0, 1, 1], [], []>} : vector<32x128xf32>, vector<128x32xf32>, vector<32x32xf32> -> vector<32x32xf32>
    %234 = vector.extract_strided_slice %230 {offsets = [0, 0], sizes = [1, 32], strides = [1, 1]} : vector<3x32xf32> to vector<1x32xf32>
    %235 = vector.broadcast %234 : vector<1x32xf32> to vector<32x32xf32>
    %236 = arith.addf %233, %235 : vector<32x32xf32>
    %cst_81 = arith.constant 0.000000e+00 : f32
    %237 = vector.broadcast %cst_81 : f32 to vector<32x32xf32>
    %238 = arith.maximumf %236, %237 : vector<32x32xf32>
    %cst_82 = arith.constant 0.000000e+00 : f32
    %239 = vector.broadcast %cst_82 : f32 to vector<32x32xf32>
    %240 = arith.select %22, %238, %239 : vector<32x32xi1>, vector<32x32xf32>
    %241 = vector.extract_strided_slice %230 {offsets = [1, 0], sizes = [1, 32], strides = [1, 1]} : vector<3x32xf32> to vector<1x32xf32>
    %242 = vector.extract_strided_slice %230 {offsets = [2, 0], sizes = [1, 32], strides = [1, 1]} : vector<3x32xf32> to vector<1x32xf32>
    %243 = arith.mulf %240, %240 : vector<32x32xf32>
    %244 = tpu.concatenate %240, %243 in 1 : vector<32x32xf32>, vector<32x32xf32> -> vector<32x64xf32>
    %cst_83 = arith.constant dense<0.000000e+00> : vector<64xf32>
    %245 = vector.multi_reduction <add>, %244, %cst_83 [0] : vector<32x64xf32> to vector<64xf32>
    %246 = vector.shape_cast %245 : vector<64xf32> to vector<1x64xf32>
    %cst_84 = arith.constant 3.125000e-02 : f32
    %247 = vector.broadcast %cst_84 : f32 to vector<1x64xf32>
    %248 = arith.mulf %246, %247 : vector<1x64xf32>
    %249 = vector.extract_strided_slice %248 {offsets = [0, 0], sizes = [1, 32], strides = [1, 1]} : vector<1x64xf32> to vector<1x32xf32>
    %250 = vector.extract_strided_slice %248 {offsets = [0, 32], sizes = [1, 32], strides = [1, 1]} : vector<1x64xf32> to vector<1x32xf32>
    %251 = arith.mulf %249, %249 : vector<1x32xf32>
    %252 = arith.subf %250, %251 : vector<1x32xf32>
    %253 = vector.broadcast %249 : vector<1x32xf32> to vector<32x32xf32>
    %254 = arith.subf %240, %253 : vector<32x32xf32>
    %cst_85 = arith.constant 9.99999974E-6 : f32
    %255 = vector.broadcast %cst_85 : f32 to vector<1x32xf32>
    %256 = arith.addf %252, %255 : vector<1x32xf32>
    %257 = math.rsqrt %256 : vector<1x32xf32>
    %258 = vector.broadcast %257 : vector<1x32xf32> to vector<32x32xf32>
    %259 = arith.mulf %254, %258 : vector<32x32xf32>
    %260 = vector.broadcast %241 : vector<1x32xf32> to vector<32x32xf32>
    %261 = arith.mulf %259, %260 : vector<32x32xf32>
    %262 = vector.broadcast %242 : vector<1x32xf32> to vector<32x32xf32>
    %263 = arith.addf %261, %262 : vector<32x32xf32>
    %264 = arith.addf %187, %263 : vector<32x32xf32>
    %c0_86 = arith.constant 0 : index
    %c0_87 = arith.constant 0 : index
    %265 = vector.load %arg5[%c0_86, %c0_87] : memref<32x128xf32, #tpu.memory_space<vmem>>, vector<32x128xf32>
    %cst_88 = arith.constant dense<0.000000e+00> : vector<32x128xf32>
    %266 = tpu.matmul %264, %265, %cst_88 {dimension_numbers = #tpu.dot_dimension_numbers<[1], [0], [0], [1], [0, 0, 1, 1], [], []>} : vector<32x32xf32>, vector<32x128xf32>, vector<32x128xf32> -> vector<32x128xf32>
    %c0_89 = arith.constant 0 : index
    %c0_90 = arith.constant 0 : index
    %267 = vector.load %arg6[%c0_89, %c0_90] : memref<1x128xf32, #tpu.memory_space<vmem>>, vector<1x128xf32>
    %268 = vector.broadcast %267 : vector<1x128xf32> to vector<32x128xf32>
    %269 = arith.addf %266, %268 : vector<32x128xf32>
    %c0_91 = arith.constant 0 : index
    %c0_92 = arith.constant 0 : index
    %270 = vector.load %arg7[%c0_91, %c0_92] : memref<32x128xf32, #tpu.memory_space<vmem>>, vector<32x128xf32>
    tpu.vector_store %arg7[%c0_91, %c0_92], %269 {strides = array<i32>} : memref<32x128xf32, #tpu.memory_space<vmem>>, vector<32x128xf32>,
    return
  }
}

</mosaic_0001>

<bundles_post_ra>
// kernel: tpu_custom_call.1
= control target key start
LH: loop header
LB: loop body
LE: loop exit
PB: predicated region body
PF: predicated region fallthrough
CT: control target
= control target key end

     0   :  { %v31_v3 = vlaneseq  ;;  %s2882_s17 = smov 32   ;;  %s2883_s18 = smov 96   ;;  %s3966_s0 = inlined_call_operand.vmem [shape: f32[32,32], index: 0, kind: input, shape index: {}]   ;;  %s3967_s1 = inlined_call_operand.vmem [shape: f32[6,128,32], index: 1, kind: input, shape index: {}]   ;;  %s3968_s2 = inlined_call_operand.vmem [shape: f32[6,3,32], index: 2, kind: input, shape index: {}]   ;;  %s3969_s3 = inlined_call_operand.vmem [shape: f32[32,32], index: 3, kind: input, shape index: {}]   ;;  %s3970_s4 = inlined_call_operand.vmem [shape: f32[1,32], index: 4, kind: input, shape index: {}]   ;;  %s3971_s5 = inlined_call_operand.vmem [shape: f32[32,128], index: 5, kind: input, shape index: {}]   ;;  %s3972_s6 = inlined_call_operand.vmem [shape: f32[1,128], index: 6, kind: input, shape index: {}]   ;;  %s3973_s7 = inlined_call_operand.hbm [shape: f32[32,128], index: 7, kind: output, shape index: {}]  }
   0x1   :  { %v2931_v0 = vld [vmem:[%s3966_s0] sm:$0xff]  ;;  %v2936_v1 = vld [vmem:[%s3966_s0 + $0x8] sm:$0xff]  ;;  %v2941_v2 = vld [vmem:[%s3966_s0 + $0x10] sm:$0xff] }
   0x2   :  { %v2662_v4 = vpack.i.bf16 %v2936_v1, %v2931_v0  ;;  %v117_v5 = vrot.slane %v2931_v0, 1  ;;  %v118_v6 = vrot.slane %v2936_v1, 1  ;;  %v2950_v7 = vld [vmem:[%s3966_s0 + $0x18] sm:$0xff]  ;;  %v186_v8 = vld [vmem:[%s3967_s1] sm:$0xff]  ;;  %v187_v9 = vld [vmem:[%s3967_s1 + $0x8] sm:$0xff]  ;;  %v2958_v10 = vshrl.u32 %v31_v3, 7 }
   0x3   :  { %v119_v11 = vrot.slane %v2941_v2, 1  ;;  %v120_v12 = vrot.slane %v2950_v7, 1  ;;  %v188_v13 = vld [vmem:[%s3967_s1 + $0x10] sm:$0xff]  ;;  %v189_v14 = vld [vmem:[%s3967_s1 + $0x18] sm:$0xff]  ;;  %v2672_v15 = vpack.i.bf16 %v2950_v7, %v2941_v2  ;;  %v2448_v16 = vpack.c.bf16 %v187_v9, %v186_v8  ;;  %v190_v18 = vld [vmem:[%s3967_s1 + $0x20] sm:$0xff] }
   0x4   :  { %2663 = vrot.lane.b32.xlu0 %v2662_v4, %s2882_s17  ;;  %2668 = vrot.lane.b32.xlu1 %v2662_v4, %s2883_s18  ;;  %v2452_v17 = vpack.c.bf16 %v189_v14, %v188_v13  ;;  %vm121_vm0 = vcmp.lt.s32.totalorder %v2958_v10, 7  ;;  %v191_v19 = vld [vmem:[%s3967_s1 + $0x28] sm:$0xff] }
   0x5   :  { %v123_v20 = vsel %vm121_vm0, %v118_v6, %v119_v11  ;;  %v124_v21 = vsel %vm121_vm0, %v117_v5, %v118_v6  ;;  %v122_v22 = vsel %vm121_vm0, %v119_v11, %v120_v12  ;;  %v125_v23 = vsel %vm121_vm0, %v120_v12, %v117_v5  ;;  %2449 = vmatprep.subr.bf16.mxu0 %v2448_v16 }
   0x6   :  { %v2677_v24 = vpack.i.bf16 %v123_v20, %v124_v21  ;;  %2451 = vmatpush3.bf16.msra.mxu0 %v2448_v16  ;;  %v2456_v25 = vpack.c.bf16 %v191_v19, %v190_v18 }
   0x7   :  { %2453 = vmatprep.subr.bf16.mxu0 %v2452_v17 }
   0x8   :  { %2673 = vrot.lane.b32.xlu1 %v2672_v15, %s2882_s17 }
   0x9   :  { %12 = vsyncpa [#allocation3], 0  ;;  %s2884_s23 = smov 64   ;;  %v2682_v26 = vpack.i.bf16 %v125_v23, %v122_v22  ;;  %v192_v27 = vld [vmem:[%s3967_s1 + $0x30] sm:$0xff]  ;;  %v193_v28 = vld [vmem:[%s3967_s1 + $0x38] sm:$0xff]  ;;  %v108_v44 = vrot.slane %v2931_v0, 7 }
   0xa   :  { %2678 = vrot.lane.b32.xlu0 %v2677_v24, %s2884_s23  ;;  %2455 = vmatpush3.bf16.msra.mxu0 %v2452_v17  ;;  %v2460_v29 = vpack.c.bf16 %v193_v28, %v192_v27  ;;  %v194_v30 = vld [vmem:[%s3967_s1 + $0x40] sm:$0xff]  ;;  %v195_v31 = vld [vmem:[%s3967_s1 + $0x48] sm:$0xff]  ;;  %v196_v33 = vld [vmem:[%s3967_s1 + $0x50] sm:$0xff]  ;;  %v111_v45 = vrot.slane %v2950_v7, 7  ;;  %v109_v46 = vrot.slane %v2936_v1, 7  ;;  %vm112_vm1 = vcmp.lt.s32.totalorder %v2958_v10, 1 }
   0xb   :  { %2457 = vmatprep.subr.bf16.mxu0 %v2456_v25  ;;  %v2464_v32 = vpack.c.bf16 %v195_v31, %v194_v30  ;;  %v197_v34 = vld [vmem:[%s3967_s1 + $0x58] sm:$0xff]  ;;  %v198_v36 = vld [vmem:[%s3967_s1 + $0x60] sm:$0xff]  ;;  %v199_v37 = vld [vmem:[%s3967_s1 + $0x68] sm:$0xff]  ;;  %vm170_vm2 = vcmask 261120   ;;  %v110_v52 = vrot.slane %v2941_v2, 7  ;;  %vm175_vm3 = vcmask 523264  }
   0xc   :  { %2688 = vrot.lane.b32.xlu1 %v2672_v15, %s2883_s18  ;;  %v2468_v35 = vpack.c.bf16 %v197_v34, %v196_v33  ;;  %v2472_v38 = vpack.c.bf16 %v199_v37, %v198_v36  ;;  %v200_v39 = vld [vmem:[%s3967_s1 + $0x70] sm:$0xff]  ;;  %v201_v40 = vld [vmem:[%s3967_s1 + $0x78] sm:$0xff]  ;;  %v116_v50 = vsel %vm112_vm1, %v111_v45, %v108_v44  ;;  %v115_v51 = vsel %vm112_vm1, %v108_v44, %v109_v46  ;;  %v3055_v23 = vld [vmem:[%s3968_s2] sm:$0x7]  ;;  %s2885_s29 = smov [#allocation2]  }
   0xd   :  { %v2476_v41 = vpack.c.bf16 %v201_v40, %v200_v39  ;;  %vm180_vm4 = vcmask 785408   ;;  %v114_v4 = vsel %vm112_vm1, %v109_v46, %v110_v52  ;;  %v113_v5 = vsel %vm112_vm1, %v110_v52, %v111_v45  ;;  %s1950_s30 = sshll.u32 %s2885_s29, 4  ;;  %s1951_s30 = int_to_ptr.vmem [resolvable:$true] %s1950_s30 }
   0xe   :  { %2683 = vrot.lane.b32.xlu0 %v2682_v26, %s2884_s23  ;;  %2459 = vmatpush3.bf16.msra.mxu0 %v2456_v25  ;;  %v3047_v21 = vsub.s32 0, %v2958_v10  ;;  %v3050_v22 = vadd.s32 8, %v2958_v10  ;;  %v3061_v26 = vadd.s32 24, %v2958_v10  ;;  %v40_v27 = vand.u32 15, %v2958_v10  ;;  %s2858_s8 = scalar_lea.vmem %s1951_s30, 512  ;;  %p2863_p1 = scmp.lt.s32.totalorder %s1951_s30, %s1951_s30 }
   0xf   :  { %2461 = vmatprep.subr.bf16.mxu0 %v2460_v29  ;;  %v3065_v28 = vadd.s32 16, %v2958_v10  ;;  %vm660_vm9 = vcmp.lt.s32.totalorder %v2958_v10, 6  ;;  %vm651_vm10 = vcmp.lt.s32.totalorder %v2958_v10, 2  ;;  %p2859_p0 = scmp.ne.s32.totalorder %s1951_s30, %s2858_s8  ;;  %p2864_p2 = scmp.lt.s32.totalorder %s2858_s8, %s2858_s8 }
  0x10   :  { %v205_v24 = vrot.slane %v3055_v23, %v3047_v21  ;;  %v47_v25 = vand.u32 15, %v3050_v22  ;;  %v61_v34 = vand.u32 15, %v3061_v26  ;;  %vm3076_vm6 = vcmp.ge.s32.totalorder %v40_v27, 1 }
  0x11   :  { %v54_v37 = vand.u32 15, %v3065_v28  ;;  %vm3413_vm12 = vcmp.ge.s32.totalorder %v40_v27, 2  ;;  %p2865_p3 = por %p2864_p2, %p2863_p1 }
  0x12   :  { %2463 = vmatpush3.bf16.msra.mxu0 %v2460_v29  ;;  %vm3069_vm5 = vcmp.lt.s32.totalorder %v47_v25, 15  ;;  %vm3091_vm7 = vcmp.lt.s32.totalorder %v61_v34, 15  ;;  %vm3407_vm11 = vcmp.lt.s32.totalorder %v47_v25, 14  ;;  %vm3432_vm13 = vcmp.lt.s32.totalorder %v61_v34, 14 }
  0x13   :  { %2465 = vmatprep.subr.bf16.mxu0 %v2464_v32  ;;  %vm3099_vm8 = vcmp.ge.s32.totalorder %v54_v37, 1  ;;  %vm3439_vm14 = vcmp.ge.s32.totalorder %v54_v37, 2  ;;  %p2866_p4 = pnand %p2865_p3, %p2859_p0 }
  0x16   :  { %2467 = vmatpush3.bf16.msra.mxu0 %v2464_v32 }
  0x17   :  { %2469 = vmatprep.subr.bf16.mxu0 %v2468_v35 }
  0x1a   :  { %2471 = vmatpush3.bf16.msra.mxu0 %v2468_v35 }
  0x1b   :  { %2473 = vmatprep.subr.bf16.mxu0 %v2472_v38 }
  0x1e   :  { %2475 = vmatpush3.bf16.msra.mxu0 %v2472_v38 }
  0x1f   :  { %2477 = vmatprep.subr.bf16.mxu0 %v2476_v41 }
  0x22   :  { %2479 = vmatpush3.bf16.msra.mxu0 %v2476_v41 }
  0x76   :  { %v2664_v42 = vpop.permute.xlu0 %2663  ;;  %v2669_v43 = vpop.permute.xlu1 %2668 }
  0x77   :  { %v2666_v47 = vunpack.i.h.bf16 %v2664_v42  ;;  %v2665_v48 = vunpack.i.l.bf16 %v2664_v42  ;;  %v2671_v54 = vunpack.i.h.bf16 %v2669_v43  ;;  %v2670_v55 = vunpack.i.l.bf16 %v2669_v43 }
  0x79   :  { %v171_v60 = vsel %vm170_vm2, %v116_v50, %v2665_v48  ;;  %v172_v61 = vsel %vm170_vm2, %v115_v51, %v2666_v47 }
  0x7a   :  { %v2674_v49 = vpop.permute.xlu1 %2673 }
  0x7b   :  { %v2676_v58 = vunpack.i.h.bf16 %v2674_v49  ;;  %v2675_v59 = vunpack.i.l.bf16 %v2674_v49 }
  0x7c   :  { %v2679_v53 = vpop.permute.xlu0 %2678 }
  0x7d   :  { %v2681_v56 = vunpack.i.h.bf16 %v2679_v53  ;;  %v2680_v57 = vunpack.i.l.bf16 %v2679_v53  ;;  %v173_v15 = vsel %vm170_vm2, %v114_v4, %v2675_v59  ;;  %v174_v16 = vsel %vm170_vm2, %v113_v5, %v2676_v58 }
  0x7e   :  { %v2689_v62 = vpop.permute.xlu1 %2688 }
  0x7f   :  { %v176_v63 = vsel %vm175_vm3, %v171_v60, %v2680_v57  ;;  %v177_v3 = vsel %vm175_vm3, %v172_v61, %v2681_v56  ;;  %v2691_v8 = vunpack.i.h.bf16 %v2689_v62  ;;  %v2690_v9 = vunpack.i.l.bf16 %v2689_v62 }
  0x80   :  { %v2684_v6 = vpop.permute.xlu0 %2683  ;;  %v181_v11 = vsel %vm180_vm4, %v176_v63, %v2670_v55  ;;  %v182_v12 = vsel %vm180_vm4, %v177_v3, %v2671_v54 }
  0x81   :  { %v2686_v13 = vunpack.i.h.bf16 %v2684_v6  ;;  %v2685_v14 = vunpack.i.l.bf16 %v2684_v6  ;;  %2224 = vmatprep.mubr.f32.mxu0 %v181_v11 }
  0x82   :  { %2225 = vmatmul.mubr.f32.vlgmr.msra.gmra.mrb[0].mxu0 %v182_v12 }
  0x83   :  { %v178_v17 = vsel %vm175_vm3, %v173_v15, %v2685_v14  ;;  %v179_v18 = vsel %vm175_vm3, %v174_v16, %v2686_v13 }
  0x84   :  { %v183_v19 = vsel %vm180_vm4, %v178_v17, %v2690_v9  ;;  %v184_v20 = vsel %vm180_vm4, %v179_v18, %v2691_v8 }
  0x85   :  { %2227 = vmatprep.mubr.f32.mxu0 %v183_v19 }
  0x86   :  { %2228 = vmatmul.mubr.f32.gmra.mrb[2].mxu0 %v184_v20 }
 0x155   :  { %v2226_v29 = vpop.f32.mrb[0].mxu0 }
 0x156   :  { %v278_v30 = vadd.f32 %v2226_v29, %v205_v24  ;;  %v272_v31 = vpop.f32.mrb[1].mxu0 }
 0x157   :  { %v273_v33 = vadd.f32 %v272_v31, %v205_v24  ;;  %v1962_v31 = vld [vmem:[%s3967_s1 + $0x80] sm:$0xff] }
 0x158   :  { %v292_v35 = vmax.f32 %v278_v30, 0.0 }
 0x159   :  { %v291_v38 = vmax.f32 %v273_v33, 0.0  ;;  %v2229_v39 = vpop.f32.mrb[2].mxu0  ;;  %v1963_v33 = vld [vmem:[%s3967_s1 + $0x88] sm:$0xff] }
 0x15a   :  { %v3083_v40 = vsel %vm3069_vm5, %v292_v35, 0.0  ;;  %v288_v41 = vadd.f32 %v2229_v39, %v205_v24  ;;  %v282_v42 = vpop.f32.mrb[3].mxu0  ;;  %v1964_v35 = vld [vmem:[%s3967_s1 + $0x90] sm:$0xff]  ;;  %v1965_v39 = vld [vmem:[%s3967_s1 + $0x98] sm:$0xff] }
 0x15b   :  { %v3087_v43 = vsel %vm3076_vm6, %v291_v38, 0.0  ;;  %v283_v45 = vadd.f32 %v282_v42, %v205_v24  ;;  %v300_v46 = vmul.f32 %v3083_v40, %v3083_v40  ;;  %v2480_v38 = vpack.c.bf16 %v1963_v33, %v1962_v31  ;;  %v1966_v42 = vld [vmem:[%s3967_s1 + $0xa0] sm:$0xff] }
 0x15c   :  { %v294_v47 = vmax.f32 %v288_v41, 0.0  ;;  %v299_v49 = vmul.f32 %v3087_v43, %v3087_v43  ;;  %v2484_v41 = vpack.c.bf16 %v1965_v39, %v1964_v35 }
 0x15d   :  { %v293_v50 = vmax.f32 %v283_v45, 0.0  ;;  %309 = vrot.lane.b32.xlu1 %v300_v46, %s2882_s17  ;;  %v1967_v45 = vld [vmem:[%s3967_s1 + $0xa8] sm:$0xff]  ;;  %2481 = vmatprep.subr.bf16.mxu1 %v2480_v38 }
 0x15e   :  { %v3108_v51 = vsel %vm3091_vm7, %v294_v47, 0.0  ;;  %307 = vrot.lane.b32.xlu0 %v299_v49, %s2882_s17  ;;  %2483 = vmatpush3.bf16.msra.mxu1 %v2480_v38  ;;  %v2488_v46 = vpack.c.bf16 %v1967_v45, %v1966_v42  ;;  %v1968_v47 = vld [vmem:[%s3967_s1 + $0xb0] sm:$0xff]  ;;  %v1969_v49 = vld [vmem:[%s3967_s1 + $0xb8] sm:$0xff] }
 0x15f   :  { %v3113_v52 = vsel %vm3099_vm8, %v293_v50, 0.0  ;;  %v302_v53 = vmul.f32 %v3108_v51, %v3108_v51  ;;  %2485 = vmatprep.subr.bf16.mxu1 %v2484_v41  ;;  %v2492_v50 = vpack.c.bf16 %v1969_v49, %v1968_v47 }
 0x160   :  { %v301_v54 = vmul.f32 %v3113_v52, %v3113_v52 }
 0x161   :  { %313 = vrot.lane.b32.xlu1 %v302_v53, %s2882_s17  ;;  %v1970_v53 = vld [vmem:[%s3967_s1 + $0xc0] sm:$0xff] }
 0x162   :  { %311 = vrot.lane.b32.xlu0 %v301_v54, %s2882_s17  ;;  %2487 = vmatpush3.bf16.msra.mxu1 %v2484_v41  ;;  %v1971_v54 = vld [vmem:[%s3967_s1 + $0xc8] sm:$0xff] }
 0x163   :  { %2489 = vmatprep.subr.bf16.mxu1 %v2488_v46 }
 0x166   :  { %2491 = vmatpush3.bf16.msra.mxu1 %v2488_v46 }
 0x167   :  { %2493 = vmatprep.subr.bf16.mxu1 %v2492_v50 }
 0x16a   :  { %2495 = vmatpush3.bf16.msra.mxu1 %v2492_v50 }
 0x1cf   :  { %v310_v55 = vpop.permute.xlu1 %309 }
 0x1d0   :  { %v320_v56 = vsel %vm170_vm2, %v3083_v40, %v310_v55  ;;  %v308_v57 = vpop.permute.xlu0 %307  ;;  %v2496_v55 = vpack.c.bf16 %v1971_v54, %v1970_v53 }
 0x1d1   :  { %v319_v58 = vsel %vm170_vm2, %v3087_v43, %v308_v57  ;;  %v324_v59 = vsel %vm175_vm3, %v320_v56, 0.0  ;;  %v1972_v56 = vld [vmem:[%s3967_s1 + $0xd0] sm:$0xff]  ;;  %v1973_v57 = vld [vmem:[%s3967_s1 + $0xd8] sm:$0xff] }
 0x1d2   :  { %v323_v60 = vsel %vm175_vm3, %v319_v58, 0.0  ;;  %2497 = vmatprep.subr.bf16.mxu1 %v2496_v55  ;;  %v2500_v58 = vpack.c.bf16 %v1973_v57, %v1972_v56 }
 0x1d3   :  { %v314_v61 = vpop.permute.xlu1 %313  ;;  %v325_v63 = vadd.f32 %v324_v59, %v323_v60  ;;  %2499 = vmatpush3.bf16.msra.mxu1 %v2496_v55  ;;  %v3173_v59 = vsub.s32 1, %v2958_v10  ;;  %v1974_v60 = vld [vmem:[%s3967_s1 + $0xe0] sm:$0xff] }
 0x1d4   :  { %v312_v62 = vpop.permute.xlu0 %311  ;;  %v322_v3 = vsel %vm170_vm2, %v3108_v51, %v314_v61  ;;  %2501 = vmatprep.subr.bf16.mxu1 %v2500_v58  ;;  %v1975_v61 = vld [vmem:[%s3967_s1 + $0xe8] sm:$0xff] }
 0x1d5   :  { %v321_v4 = vsel %vm170_vm2, %v3113_v52, %v312_v62  ;;  %v328_v8 = vsel %vm175_vm3, %v322_v3, 0.0  ;;  %v2504_v62 = vpack.c.bf16 %v1975_v61, %v1974_v60  ;;  %v364_v3 = vrot.slane %v3055_v23, %v3173_v59 }
 0x1d6   :  { %v326_v5 = vsel %vm175_vm3, %v321_v4, 0.0 }
 0x1d7   :  { %v327_v6 = vadd.f32 %v326_v5, %v325_v63  ;;  %2503 = vmatpush3.bf16.msra.mxu1 %v2500_v58  ;;  %v3182_v63 = vsub.s32 2, %v2958_v10  ;;  %v1976_v5 = vld [vmem:[%s3967_s1 + $0xf0] sm:$0xff] }
 0x1d8   :  { %2505 = vmatprep.subr.bf16.mxu1 %v2504_v62 }
 0x1d9   :  { %v329_v9 = vadd.f32 %v328_v8, %v327_v6  ;;  %v1977_v6 = vld [vmem:[%s3967_s1 + $0xf8] sm:$0xff] }
 0x1db   :  { %v330_v11 = vrot.slane %v329_v9, 4  ;;  %2507 = vmatpush3.bf16.msra.mxu1 %v2504_v62 }
 0x1dd   :  { %v331_v12 = vadd.f32 %v330_v11, %v329_v9 }
 0x1df   :  { %v332_v13 = vrot.slane %v331_v12, 2 }
 0x1e1   :  { %v333_v14 = vadd.f32 %v332_v13, %v331_v12  ;;  %v2508_v12 = vpack.c.bf16 %v1977_v6, %v1976_v5  ;;  %v372_v13 = vrot.slane %v3055_v23, %v3182_v63 }
 0x1e3   :  { %v334_v15 = vrot.slane %v333_v14, 1  ;;  %2509 = vmatprep.subr.bf16.mxu1 %v2508_v12 }
 0x1e4   :  { %2511 = vmatpush3.bf16.msra.mxu1 %v2508_v12 }
 0x1e5   :  { %v335_v16 = vadd.f32 %v334_v15, %v333_v14 }
 0x1e7   :  { %v336_v17 = vmul.f32 0.03125, %v335_v16 }
 0x1e9   :  { %v337_v18 = vmul.f32 %v336_v17, %v336_v17  ;;  %v343_v4 = vsub.f32 %v3087_v43, %v336_v17  ;;  %v344_v8 = vsub.f32 %v3083_v40, %v336_v17  ;;  %v345_v9 = vsub.f32 %v3113_v52, %v336_v17 }
 0x1ea   :  { %v346_v11 = vsub.f32 %v3108_v51, %v336_v17 }
 0x1eb   :  { %339 = vrot.lane.b32.xlu0 %v337_v18, %s2882_s17 }
 0x25d   :  { %v340_v19 = vpop.permute.xlu0 %339 }
 0x25e   :  { %v342_v20 = vsub.f32 %v336_v17, %v340_v19 }
 0x260   :  { %v347_v24 = vadd.f32 1e-05, %v342_v20 }
 0x262   :  { %2842 = vrsqrt.f32 %v347_v24 }
 0x26c   :  { %v2843_v29 = vpop.eup %2842 }
 0x26d   :  { %v352_v30 = vrot.slane %v2843_v29, %v3047_v21 }
 0x26f   :  { %354 = vrot.lane.b32.xlu1 %v352_v30, %s2883_s18 }
 0x2e1   :  { %v355_v43 = vpop.permute.xlu1 %354 }
 0x2e2   :  { %v357_v14 = vmul.f32 %v355_v43, %v343_v4  ;;  %v358_v15 = vmul.f32 %v355_v43, %v344_v8  ;;  %v359_v16 = vmul.f32 %v355_v43, %v345_v9  ;;  %v360_v18 = vmul.f32 %v355_v43, %v346_v11 }
 0x2e4   :  { %v365_v19 = vmul.f32 %v364_v3, %v357_v14  ;;  %v366_v20 = vmul.f32 %v364_v3, %v358_v15  ;;  %v367_v24 = vmul.f32 %v364_v3, %v359_v16  ;;  %v368_v29 = vmul.f32 %v364_v3, %v360_v18 }
 0x2e6   :  { %v373_v40 = vadd.f32 %v372_v13, %v365_v19  ;;  %v374_v30 = vadd.f32 %v372_v13, %v366_v20  ;;  %v375_v52 = vadd.f32 %v372_v13, %v367_v24  ;;  %v376_v31 = vadd.f32 %v372_v13, %v368_v29 }
 0x2e8   :  { %v2692_v51 = vpack.i.bf16 %v374_v30, %v373_v40  ;;  %v385_v17 = vrot.slane %v373_v40, 1  ;;  %v386_v33 = vrot.slane %v374_v30, 1  ;;  %v387_v35 = vrot.slane %v375_v52, 1 }
 0x2e9   :  { %v388_v23 = vrot.slane %v376_v31, 1  ;;  %v377_v41 = vrot.slane %v373_v40, 7  ;;  %v380_v42 = vrot.slane %v376_v31, 7  ;;  %v378_v46 = vrot.slane %v374_v30, 7 }
 0x2ea   :  { %2693 = vrot.lane.b32.xlu0 %v2692_v51, %s2882_s17  ;;  %v390_v38 = vsel %vm121_vm0, %v386_v33, %v387_v35  ;;  %v391_v39 = vsel %vm121_vm0, %v385_v17, %v386_v33  ;;  %v379_v49 = vrot.slane %v375_v52, 7  ;;  %v2707_v57 = vpack.i.bf16 %v376_v31, %v375_v52 }
 0x2eb   :  { %v2702_v45 = vpack.i.bf16 %v390_v38, %v391_v39  ;;  %v384_v47 = vsel %vm112_vm1, %v380_v42, %v377_v41  ;;  %v389_v50 = vsel %vm121_vm0, %v387_v35, %v388_v23  ;;  %v392_v53 = vsel %vm121_vm0, %v388_v23, %v385_v17  ;;  %v3235_v38 = vld [vmem:[%s3968_s2 + $0x4] sm:$0x7] }
 0x2ec   :  { %v383_v54 = vsel %vm112_vm1, %v377_v41, %v378_v46  ;;  %v382_v55 = vsel %vm112_vm1, %v378_v46, %v379_v49  ;;  %v381_v56 = vsel %vm112_vm1, %v379_v49, %v380_v42  ;;  %v2712_v58 = vpack.i.bf16 %v392_v53, %v389_v50 }
 0x2ed   :  { %2703 = vrot.lane.b32.xlu1 %v2702_v45, %s2884_s23  ;;  %v471_v39 = vrot.slane %v3235_v38, %v3047_v21 }
 0x2ee   :  { %2698 = vrot.lane.b32.xlu0 %v2692_v51, %s2883_s18 }
 0x2f1   :  { %2708 = vrot.lane.b32.xlu1 %v2707_v57, %s2882_s17 }
 0x2f2   :  { %2713 = vrot.lane.b32.xlu0 %v2712_v58, %s2884_s23 }
 0x2f5   :  { %2718 = vrot.lane.b32.xlu1 %v2707_v57, %s2883_s18 }
 0x35c   :  { %v2694_v60 = vpop.permute.xlu0 %2693 }
 0x35d   :  { %v2696_v61 = vunpack.i.h.bf16 %v2694_v60  ;;  %v2695_v62 = vunpack.i.l.bf16 %v2694_v60 }
 0x35f   :  { %v2704_v3 = vpop.permute.xlu1 %2703  ;;  %v437_v11 = vsel %vm170_vm2, %v384_v47, %v2695_v62  ;;  %v438_v12 = vsel %vm170_vm2, %v383_v54, %v2696_v61 }
 0x360   :  { %v2706_v4 = vunpack.i.h.bf16 %v2704_v3  ;;  %v2705_v5 = vunpack.i.l.bf16 %v2704_v3  ;;  %v2699_v6 = vpop.permute.xlu0 %2698 }
 0x361   :  { %v2701_v8 = vunpack.i.h.bf16 %v2699_v6  ;;  %v2700_v9 = vunpack.i.l.bf16 %v2699_v6 }
 0x362   :  { %v441_v13 = vsel %vm175_vm3, %v437_v11, %v2705_v5  ;;  %v442_v43 = vsel %vm175_vm3, %v438_v12, %v2706_v4 }
 0x363   :  { %v2709_v14 = vpop.permute.xlu1 %2708  ;;  %v445_v15 = vsel %vm180_vm4, %v441_v13, %v2700_v9  ;;  %v446_v16 = vsel %vm180_vm4, %v442_v43, %v2701_v8 }
 0x364   :  { %v2711_v18 = vunpack.i.h.bf16 %v2709_v14  ;;  %v2710_v19 = vunpack.i.l.bf16 %v2709_v14  ;;  %v2714_v20 = vpop.permute.xlu0 %2713  ;;  %2262 = vmatprep.mubr.f32.mxu1 %v445_v15 }
 0x365   :  { %v2716_v24 = vunpack.i.h.bf16 %v2714_v20  ;;  %v2715_v29 = vunpack.i.l.bf16 %v2714_v20  ;;  %2263 = vmatmul.mubr.f32.vlgmr.msra.gmra.mrb[0].mxu1 %v446_v16 }
 0x366   :  { %v439_v40 = vsel %vm170_vm2, %v382_v55, %v2710_v19  ;;  %v440_v30 = vsel %vm170_vm2, %v381_v56, %v2711_v18 }
 0x367   :  { %v2719_v52 = vpop.permute.xlu1 %2718  ;;  %v443_v17 = vsel %vm175_vm3, %v439_v40, %v2715_v29  ;;  %v444_v33 = vsel %vm175_vm3, %v440_v30, %v2716_v24 }
 0x368   :  { %v2721_v31 = vunpack.i.h.bf16 %v2719_v52  ;;  %v2720_v51 = vunpack.i.l.bf16 %v2719_v52 }
 0x36a   :  { %v447_v35 = vsel %vm180_vm4, %v443_v17, %v2720_v51  ;;  %v448_v23 = vsel %vm180_vm4, %v444_v33, %v2721_v31 }
 0x36b   :  { %2265 = vmatprep.mubr.f32.mxu1 %v447_v35 }
 0x36c   :  { %2266 = vmatmul.mubr.f32.gmra.mrb[2].mxu1 %v448_v23 }
 0x438   :  { %v2264_v41 = vpop.f32.mrb[0].mxu1 }
 0x439   :  { %v544_v42 = vadd.f32 %v2264_v41, %v471_v39  ;;  %v538_v45 = vpop.f32.mrb[1].mxu1 }
 0x43a   :  { %v539_v46 = vadd.f32 %v538_v45, %v471_v39 }
 0x43b   :  { %v558_v47 = vmax.f32 %v544_v42, 0.0 }
 0x43c   :  { %v557_v49 = vmax.f32 %v539_v46, 0.0 }
 0x43d   :  { %v3241_v50 = vsel %vm3069_vm5, %v558_v47, 0.0  ;;  %v1979_v47 = vld [vmem:[%s3967_s1 + $0x100] sm:$0xff] }
 0x43e   :  { %v3245_v53 = vsel %vm3076_vm6, %v557_v49, 0.0  ;;  %v566_v54 = vmul.f32 %v3241_v50, %v3241_v50  ;;  %v1980_v49 = vld [vmem:[%s3967_s1 + $0x108] sm:$0xff] }
 0x43f   :  { %v2267_v55 = vpop.f32.mrb[2].mxu1  ;;  %v565_v56 = vmul.f32 %v3245_v53, %v3245_v53 }
 0x440   :  { %v554_v57 = vadd.f32 %v2267_v55, %v471_v39  ;;  %575 = vrot.lane.b32.xlu1 %v566_v54, %s2882_s17  ;;  %v548_v58 = vpop.f32.mrb[3].mxu1  ;;  %v1981_v54 = vld [vmem:[%s3967_s1 + $0x110] sm:$0xff]  ;;  %v2512_v55 = vpack.c.bf16 %v1980_v49, %v1979_v47 }
 0x441   :  { %v549_v60 = vadd.f32 %v548_v58, %v471_v39  ;;  %573 = vrot.lane.b32.xlu0 %v565_v56, %s2882_s17  ;;  %v1982_v56 = vld [vmem:[%s3967_s1 + $0x118] sm:$0xff]  ;;  %v1983_v58 = vld [vmem:[%s3967_s1 + $0x120] sm:$0xff] }
 0x442   :  { %v560_v61 = vmax.f32 %v554_v57, 0.0  ;;  %v2516_v57 = vpack.c.bf16 %v1982_v56, %v1981_v54  ;;  %2513 = vmatprep.subr.bf16.mxu0 %v2512_v55 }
 0x443   :  { %v559_v62 = vmax.f32 %v549_v60, 0.0  ;;  %v1984_v60 = vld [vmem:[%s3967_s1 + $0x128] sm:$0xff]  ;;  %2515 = vmatpush3.bf16.msra.mxu0 %v2512_v55 }
 0x444   :  { %v3255_v3 = vsel %vm3091_vm7, %v560_v61, 0.0  ;;  %2517 = vmatprep.subr.bf16.mxu0 %v2516_v57  ;;  %v2520_v61 = vpack.c.bf16 %v1984_v60, %v1983_v58 }
 0x445   :  { %v3259_v4 = vsel %vm3099_vm8, %v559_v62, 0.0  ;;  %v568_v5 = vmul.f32 %v3255_v3, %v3255_v3  ;;  %v1985_v62 = vld [vmem:[%s3967_s1 + $0x130] sm:$0xff] }
 0x446   :  { %v567_v6 = vmul.f32 %v3259_v4, %v3259_v4 }
 0x447   :  { %579 = vrot.lane.b32.xlu1 %v568_v5, %s2882_s17  ;;  %v1986_v5 = vld [vmem:[%s3967_s1 + $0x138] sm:$0xff]  ;;  %2519 = vmatpush3.bf16.msra.mxu0 %v2516_v57 }
 0x448   :  { %577 = vrot.lane.b32.xlu0 %v567_v6, %s2882_s17  ;;  %2521 = vmatprep.subr.bf16.mxu0 %v2520_v61  ;;  %v2524_v6 = vpack.c.bf16 %v1986_v5, %v1985_v62 }
 0x44b   :  { %2523 = vmatpush3.bf16.msra.mxu0 %v2520_v61 }
 0x44c   :  { %2525 = vmatprep.subr.bf16.mxu0 %v2524_v6 }
 0x44f   :  { %2527 = vmatpush3.bf16.msra.mxu0 %v2524_v6 }
 0x4b2   :  { %v576_v8 = vpop.permute.xlu1 %575 }
 0x4b3   :  { %v574_v9 = vpop.permute.xlu0 %573  ;;  %v586_v11 = vsel %vm170_vm2, %v3241_v50, %v576_v8  ;;  %v1987_v8 = vld [vmem:[%s3967_s1 + $0x140] sm:$0xff] }
 0x4b4   :  { %v585_v12 = vsel %vm170_vm2, %v3245_v53, %v574_v9  ;;  %v590_v13 = vsel %vm175_vm3, %v586_v11, 0.0  ;;  %v1988_v9 = vld [vmem:[%s3967_s1 + $0x148] sm:$0xff] }
 0x4b5   :  { %v589_v43 = vsel %vm175_vm3, %v585_v12, 0.0  ;;  %v2528_v11 = vpack.c.bf16 %v1988_v9, %v1987_v8  ;;  %v1989_v12 = vld [vmem:[%s3967_s1 + $0x150] sm:$0xff] }
 0x4b6   :  { %v591_v16 = vadd.f32 %v590_v13, %v589_v43  ;;  %v1990_v13 = vld [vmem:[%s3967_s1 + $0x158] sm:$0xff] }
 0x4b7   :  { %2529 = vmatprep.subr.bf16.mxu0 %v2528_v11  ;;  %v2532_v43 = vpack.c.bf16 %v1990_v13, %v1989_v12 }
 0x4b8   :  { %2531 = vmatpush3.bf16.msra.mxu0 %v2528_v11 }
 0x4b9   :  { %v580_v14 = vpop.permute.xlu1 %579  ;;  %2533 = vmatprep.subr.bf16.mxu0 %v2532_v43 }
 0x4ba   :  { %v578_v15 = vpop.permute.xlu0 %577  ;;  %v588_v18 = vsel %vm170_vm2, %v3255_v3, %v580_v14  ;;  %v630_v14 = vrot.slane %v3235_v38, %v3173_v59 }
 0x4bb   :  { %v587_v19 = vsel %vm170_vm2, %v3259_v4, %v578_v15  ;;  %v594_v29 = vsel %vm175_vm3, %v588_v18, 0.0 }
 0x4bc   :  { %v592_v20 = vsel %vm175_vm3, %v587_v19, 0.0  ;;  %2535 = vmatpush3.bf16.msra.mxu0 %v2532_v43 }
 0x4bd   :  { %v593_v24 = vadd.f32 %v592_v20, %v591_v16  ;;  %v1991_v20 = vld [vmem:[%s3967_s1 + $0x160] sm:$0xff] }
 0x4bf   :  { %v595_v40 = vadd.f32 %v594_v29, %v593_v24  ;;  %v1992_v24 = vld [vmem:[%s3967_s1 + $0x168] sm:$0xff]  ;;  %v638_v29 = vrot.slane %v3235_v38, %v3182_v63  ;;  %v1994_v38 = vld [vmem:[%s3967_s1 + $0x178] sm:$0xff] }
 0x4c1   :  { %v596_v30 = vrot.slane %v595_v40, 4 }
 0x4c3   :  { %v597_v52 = vadd.f32 %v596_v30, %v595_v40  ;;  %v2536_v30 = vpack.c.bf16 %v1992_v24, %v1991_v20 }
 0x4c5   :  { %v598_v31 = vrot.slane %v597_v52, 2  ;;  %2537 = vmatprep.subr.bf16.mxu0 %v2536_v30 }
 0x4c6   :  { %2539 = vmatpush3.bf16.msra.mxu0 %v2536_v30 }
 0x4c7   :  { %v599_v51 = vadd.f32 %v598_v31, %v597_v52 }
 0x4c9   :  { %v600_v17 = vrot.slane %v599_v51, 1 }
 0x4cb   :  { %v601_v33 = vadd.f32 %v600_v17, %v599_v51 }
 0x4cd   :  { %v602_v35 = vmul.f32 0.03125, %v601_v33  ;;  %v1993_v33 = vld [vmem:[%s3967_s1 + $0x170] sm:$0xff] }
 0x4cf   :  { %v603_v23 = vmul.f32 %v602_v35, %v602_v35  ;;  %v609_v15 = vsub.f32 %v3245_v53, %v602_v35  ;;  %v610_v16 = vsub.f32 %v3241_v50, %v602_v35  ;;  %v611_v18 = vsub.f32 %v3259_v4, %v602_v35 }
 0x4d0   :  { %v612_v19 = vsub.f32 %v3255_v3, %v602_v35 }
 0x4d1   :  { %605 = vrot.lane.b32.xlu0 %v603_v23, %s2882_s17 }
 0x543   :  { %v606_v39 = vpop.permute.xlu0 %605 }
 0x544   :  { %v608_v41 = vsub.f32 %v602_v35, %v606_v39  ;;  %v2540_v35 = vpack.c.bf16 %v1994_v38, %v1993_v33 }
 0x546   :  { %v613_v42 = vadd.f32 1e-05, %v608_v41  ;;  %2541 = vmatprep.subr.bf16.mxu0 %v2540_v35 }
 0x547   :  { %2543 = vmatpush3.bf16.msra.mxu0 %v2540_v35 }
 0x548   :  { %2844 = vrsqrt.f32 %v613_v42 }
 0x552   :  { %v2845_v45 = vpop.eup %2844 }
 0x553   :  { %v618_v46 = vrot.slane %v2845_v45, %v3047_v21 }
 0x555   :  { %620 = vrot.lane.b32.xlu1 %v618_v46, %s2883_s18 }
 0x5c7   :  { %v621_v40 = vpop.permute.xlu1 %620 }
 0x5c8   :  { %v623_v53 = vmul.f32 %v621_v40, %v609_v15  ;;  %v624_v52 = vmul.f32 %v621_v40, %v610_v16  ;;  %v625_v50 = vmul.f32 %v621_v40, %v611_v18  ;;  %v626_v31 = vmul.f32 %v621_v40, %v612_v19 }
 0x5ca   :  { %v631_v4 = vmul.f32 %v630_v14, %v623_v53  ;;  %v632_v3 = vmul.f32 %v630_v14, %v624_v52  ;;  %v633_v51 = vmul.f32 %v630_v14, %v625_v50  ;;  %v634_v17 = vmul.f32 %v630_v14, %v626_v31 }
 0x5cc   :  { %v639_v23 = vadd.f32 %v638_v29, %v631_v4  ;;  %v640_v39 = vadd.f32 %v638_v29, %v632_v3  ;;  %v641_v41 = vadd.f32 %v638_v29, %v633_v51  ;;  %v642_v42 = vadd.f32 %v638_v29, %v634_v17 }
 0x5ce   :  { %v3339_v45 = vadd.f32 %v639_v23, %v2931_v0  ;;  %v3342_v46 = vadd.f32 %v640_v39, %v2936_v1  ;;  %v3345_v47 = vadd.f32 %v641_v41, %v2941_v2  ;;  %v3348_v49 = vadd.f32 %v642_v42, %v2950_v7 }
 0x5d0   :  { %v2722_v54 = vpack.i.bf16 %v3342_v46, %v3339_v45  ;;  %v656_v55 = vrot.slane %v3339_v45, 2  ;;  %v657_v0 = vrot.slane %v3342_v46, 2  ;;  %v658_v56 = vrot.slane %v3345_v47, 2 }
 0x5d1   :  { %v659_v1 = vrot.slane %v3348_v49, 2  ;;  %v2737_v61 = vpack.i.bf16 %v3348_v49, %v3345_v47  ;;  %v648_v5 = vrot.slane %v3342_v46, 6  ;;  %v647_v6 = vrot.slane %v3339_v45, 6 }
 0x5d2   :  { %2723 = vrot.lane.b32.xlu0 %v2722_v54, %s2882_s17  ;;  %v662_v2 = vsel %vm660_vm9, %v657_v0, %v658_v56  ;;  %v663_v7 = vsel %vm660_vm9, %v656_v55, %v657_v0  ;;  %v650_v9 = vrot.slane %v3348_v49, 6  ;;  %v649_v19 = vrot.slane %v3345_v47, 6 }
 0x5d3   :  { %v2732_v57 = vpack.i.bf16 %v662_v2, %v663_v7  ;;  %v661_v58 = vsel %vm660_vm9, %v658_v56, %v659_v1  ;;  %v664_v60 = vsel %vm660_vm9, %v659_v1, %v656_v55  ;;  %v654_v13 = vsel %vm651_vm10, %v647_v6, %v648_v5  ;;  %v3401_v2 = vld [vmem:[%s3968_s2 + $0x8] sm:$0x7] }
 0x5d4   :  { %v2742_v62 = vpack.i.bf16 %v664_v60, %v661_v58  ;;  %v655_v18 = vsel %vm651_vm10, %v650_v9, %v647_v6  ;;  %v653_v38 = vsel %vm651_vm10, %v648_v5, %v649_v19  ;;  %v652_v35 = vsel %vm651_vm10, %v649_v19, %v650_v9 }
 0x5d5   :  { %2733 = vrot.lane.b32.xlu1 %v2732_v57, %s2884_s23  ;;  %v743_v7 = vrot.slane %v3401_v2, %v3047_v21 }
 0x5d6   :  { %2728 = vrot.lane.b32.xlu0 %v2722_v54, %s2883_s18 }
 0x5d9   :  { %2738 = vrot.lane.b32.xlu1 %v2737_v61, %s2882_s17 }
 0x5da   :  { %2743 = vrot.lane.b32.xlu0 %v2742_v62, %s2884_s23 }
 0x5dd   :  { %2748 = vrot.lane.b32.xlu1 %v2737_v61, %s2883_s18 }
 0x644   :  { %v2724_v8 = vpop.permute.xlu0 %2723 }
 0x645   :  { %v2726_v11 = vunpack.i.h.bf16 %v2724_v8  ;;  %v2725_v12 = vunpack.i.l.bf16 %v2724_v8 }
 0x647   :  { %v2734_v43 = vpop.permute.xlu1 %2733  ;;  %v710_v20 = vsel %vm170_vm2, %v654_v13, %v2726_v11  ;;  %v709_v40 = vsel %vm170_vm2, %v655_v18, %v2725_v12 }
 0x648   :  { %v2736_v14 = vunpack.i.h.bf16 %v2734_v43  ;;  %v2735_v15 = vunpack.i.l.bf16 %v2734_v43  ;;  %v2729_v16 = vpop.permute.xlu0 %2728 }
 0x649   :  { %v2731_v24 = vunpack.i.h.bf16 %v2729_v16  ;;  %v2730_v29 = vunpack.i.l.bf16 %v2729_v16 }
 0x64a   :  { %v714_v30 = vsel %vm175_vm3, %v710_v20, %v2736_v14  ;;  %v713_v53 = vsel %vm175_vm3, %v709_v40, %v2735_v15 }
 0x64b   :  { %v2739_v52 = vpop.permute.xlu1 %2738  ;;  %v717_v50 = vsel %vm180_vm4, %v713_v53, %v2730_v29  ;;  %v718_v31 = vsel %vm180_vm4, %v714_v30, %v2731_v24 }
 0x64c   :  { %v2741_v4 = vunpack.i.h.bf16 %v2739_v52  ;;  %v2740_v3 = vunpack.i.l.bf16 %v2739_v52  ;;  %v2744_v51 = vpop.permute.xlu0 %2743  ;;  %2300 = vmatprep.mubr.f32.mxu0 %v717_v50 }
 0x64d   :  { %v2746_v17 = vunpack.i.h.bf16 %v2744_v51  ;;  %v2745_v33 = vunpack.i.l.bf16 %v2744_v51  ;;  %2301 = vmatmul.mubr.f32.vlgmr.msra.gmra.mrb[4].mxu0 %v718_v31 }
 0x64e   :  { %v711_v23 = vsel %vm170_vm2, %v653_v38, %v2740_v3  ;;  %v712_v39 = vsel %vm170_vm2, %v652_v35, %v2741_v4 }
 0x64f   :  { %v2749_v41 = vpop.permute.xlu1 %2748  ;;  %v715_v55 = vsel %vm175_vm3, %v711_v23, %v2745_v33  ;;  %v716_v0 = vsel %vm175_vm3, %v712_v39, %v2746_v17 }
 0x650   :  { %v2751_v42 = vunpack.i.h.bf16 %v2749_v41  ;;  %v2750_v54 = vunpack.i.l.bf16 %v2749_v41 }
 0x652   :  { %v719_v56 = vsel %vm180_vm4, %v715_v55, %v2750_v54  ;;  %v720_v1 = vsel %vm180_vm4, %v716_v0, %v2751_v42 }
 0x653   :  { %2303 = vmatprep.mubr.f32.mxu0 %v719_v56 }
 0x654   :  { %2304 = vmatmul.mubr.f32.gmra.mrb[6].mxu0 %v720_v1 }
 0x720   :  { %v2302_v57 = vpop.f32.mrb[4].mxu0 }
 0x721   :  { %v816_v58 = vadd.f32 %v2302_v57, %v743_v7  ;;  %v810_v60 = vpop.f32.mrb[5].mxu0 }
 0x722   :  { %v811_v62 = vadd.f32 %v810_v60, %v743_v7  ;;  %v1997_v60 = vld [vmem:[%s3967_s1 + $0x188] sm:$0xff] }
 0x723   :  { %v830_v5 = vmax.f32 %v816_v58, 0.0  ;;  %v1996_v58 = vld [vmem:[%s3967_s1 + $0x180] sm:$0xff] }
 0x724   :  { %v829_v8 = vmax.f32 %v811_v62, 0.0  ;;  %v1998_v62 = vld [vmem:[%s3967_s1 + $0x190] sm:$0xff] }
 0x725   :  { %v3419_v9 = vsel %vm3407_vm11, %v830_v5, 0.0  ;;  %v2544_v5 = vpack.c.bf16 %v1997_v60, %v1996_v58 }
 0x726   :  { %v3423_v22 = vsel %vm3413_vm12, %v829_v8, 0.0  ;;  %v838_v25 = vmul.f32 %v3419_v9, %v3419_v9  ;;  %v1999_v8 = vld [vmem:[%s3967_s1 + $0x198] sm:$0xff] }
 0x727   :  { %v2305_v11 = vpop.f32.mrb[6].mxu0  ;;  %v837_v12 = vmul.f32 %v3423_v22, %v3423_v22  ;;  %2545 = vmatprep.subr.bf16.mxu1 %v2544_v5 }
 0x728   :  { %v826_v27 = vadd.f32 %v2305_v11, %v743_v7  ;;  %847 = vrot.lane.b32.xlu1 %v838_v25, %s2882_s17  ;;  %v820_v13 = vpop.f32.mrb[7].mxu0  ;;  %v2548_v25 = vpack.c.bf16 %v1999_v8, %v1998_v62  ;;  %v2000_v11 = vld [vmem:[%s3967_s1 + $0x1a0] sm:$0xff]  ;;  %2547 = vmatpush3.bf16.msra.mxu1 %v2544_v5 }
 0x729   :  { %v821_v14 = vadd.f32 %v820_v13, %v743_v7  ;;  %845 = vrot.lane.b32.xlu0 %v837_v12, %s2882_s17  ;;  %v2001_v12 = vld [vmem:[%s3967_s1 + $0x1a8] sm:$0xff]  ;;  %v2002_v13 = vld [vmem:[%s3967_s1 + $0x1b0] sm:$0xff] }
 0x72a   :  { %v832_v15 = vmax.f32 %v826_v27, 0.0  ;;  %2549 = vmatprep.subr.bf16.mxu1 %v2548_v25  ;;  %v2552_v27 = vpack.c.bf16 %v2001_v12, %v2000_v11 }
 0x72b   :  { %v831_v18 = vmax.f32 %v821_v14, 0.0  ;;  %v2003_v14 = vld [vmem:[%s3967_s1 + $0x1b8] sm:$0xff] }
 0x72c   :  { %v3445_v19 = vsel %vm3432_vm13, %v832_v15, 0.0  ;;  %2551 = vmatpush3.bf16.msra.mxu1 %v2548_v25  ;;  %v2556_v15 = vpack.c.bf16 %v2003_v14, %v2002_v13 }
 0x72d   :  { %v3449_v26 = vsel %vm3439_vm14, %v831_v18, 0.0  ;;  %v840_v34 = vmul.f32 %v3445_v19, %v3445_v19  ;;  %2553 = vmatprep.subr.bf16.mxu1 %v2552_v27  ;;  %v2004_v18 = vld [vmem:[%s3967_s1 + $0x1c0] sm:$0xff] }
 0x72e   :  { %v839_v20 = vmul.f32 %v3449_v26, %v3449_v26 }
 0x72f   :  { %851 = vrot.lane.b32.xlu1 %v840_v34, %s2882_s17  ;;  %v2005_v34 = vld [vmem:[%s3967_s1 + $0x1c8] sm:$0xff] }
 0x730   :  { %849 = vrot.lane.b32.xlu0 %v839_v20, %s2882_s17  ;;  %2555 = vmatpush3.bf16.msra.mxu1 %v2552_v27  ;;  %v2560_v20 = vpack.c.bf16 %v2005_v34, %v2004_v18 }
 0x731   :  { %2557 = vmatprep.subr.bf16.mxu1 %v2556_v15 }
 0x734   :  { %2559 = vmatpush3.bf16.msra.mxu1 %v2556_v15 }
 0x735   :  { %2561 = vmatprep.subr.bf16.mxu1 %v2560_v20 }
 0x738   :  { %2563 = vmatpush3.bf16.msra.mxu1 %v2560_v20 }
 0x79a   :  { %v848_v28 = vpop.permute.xlu1 %847 }
 0x79b   :  { %v846_v37 = vpop.permute.xlu0 %845  ;;  %v858_v24 = vsel %vm170_vm2, %v3419_v9, %v848_v28  ;;  %v2006_v28 = vld [vmem:[%s3967_s1 + $0x1d0] sm:$0xff] }
 0x79c   :  { %v857_v29 = vsel %vm170_vm2, %v3423_v22, %v846_v37  ;;  %v862_v40 = vsel %vm175_vm3, %v858_v24, 0.0  ;;  %v2007_v37 = vld [vmem:[%s3967_s1 + $0x1d8] sm:$0xff] }
 0x79d   :  { %v861_v30 = vsel %vm175_vm3, %v857_v29, 0.0  ;;  %v2564_v24 = vpack.c.bf16 %v2007_v37, %v2006_v28  ;;  %v2008_v29 = vld [vmem:[%s3967_s1 + $0x1e0] sm:$0xff] }
 0x79e   :  { %v863_v50 = vadd.f32 %v862_v40, %v861_v30  ;;  %v2009_v40 = vld [vmem:[%s3967_s1 + $0x1e8] sm:$0xff]  ;;  %v902_v30 = vrot.slane %v3401_v2, %v3173_v59 }
 0x79f   :  { %2565 = vmatprep.subr.bf16.mxu1 %v2564_v24 }
 0x7a0   :  { %2567 = vmatpush3.bf16.msra.mxu1 %v2564_v24 }
 0x7a1   :  { %v852_v53 = vpop.permute.xlu1 %851 }
 0x7a2   :  { %v850_v52 = vpop.permute.xlu0 %849  ;;  %v860_v31 = vsel %vm170_vm2, %v3445_v19, %v852_v53  ;;  %v2568_v53 = vpack.c.bf16 %v2009_v40, %v2008_v29 }
 0x7a3   :  { %v859_v4 = vsel %vm170_vm2, %v3449_v26, %v850_v52  ;;  %v866_v17 = vsel %vm175_vm3, %v860_v31, 0.0 }
 0x7a4   :  { %v864_v3 = vsel %vm175_vm3, %v859_v4, 0.0  ;;  %2569 = vmatprep.subr.bf16.mxu1 %v2568_v53 }
 0x7a5   :  { %v865_v51 = vadd.f32 %v864_v3, %v863_v50  ;;  %v910_v3 = vrot.slane %v3401_v2, %v3182_v63  ;;  %2571 = vmatpush3.bf16.msra.mxu1 %v2568_v53 }
 0x7a7   :  { %v867_v33 = vadd.f32 %v866_v17, %v865_v51 }
 0x7a9   :  { %v868_v38 = vrot.slane %v867_v33, 4 }
 0x7ab   :  { %v869_v35 = vadd.f32 %v868_v38, %v867_v33 }
 0x7ad   :  { %v870_v23 = vrot.slane %v869_v35, 2 }
 0x7af   :  { %v871_v39 = vadd.f32 %v870_v23, %v869_v35 }
 0x7b1   :  { %v872_v41 = vrot.slane %v871_v39, 1 }
 0x7b3   :  { %v873_v42 = vadd.f32 %v872_v41, %v871_v39 }
 0x7b5   :  { %v874_v54 = vmul.f32 0.03125, %v873_v42 }
 0x7b7   :  { %v875_v55 = vmul.f32 %v874_v54, %v874_v54  ;;  %v881_v52 = vsub.f32 %v3423_v22, %v874_v54  ;;  %v882_v50 = vsub.f32 %v3419_v9, %v874_v54  ;;  %v883_v31 = vsub.f32 %v3449_v26, %v874_v54  ;;  %v2010_v22 = vld [vmem:[%s3967_s1 + $0x1f0] sm:$0xff]  ;;  %v2011_v9 = vld [vmem:[%s3967_s1 + $0x1f8] sm:$0xff] }
 0x7b8   :  { %v884_v4 = vsub.f32 %v3445_v19, %v874_v54  ;;  %v2572_v26 = vpack.c.bf16 %v2011_v9, %v2010_v22 }
 0x7b9   :  { %877 = vrot.lane.b32.xlu0 %v875_v55, %s2882_s17 }
 0x7ba   :  { %2573 = vmatprep.subr.bf16.mxu1 %v2572_v26 }
 0x7bb   :  { %2575 = vmatpush3.bf16.msra.mxu1 %v2572_v26 }
 0x82b   :  { %v878_v0 = vpop.permute.xlu0 %877 }
 0x82c   :  { %v880_v56 = vsub.f32 %v874_v54, %v878_v0 }
 0x82e   :  { %v885_v1 = vadd.f32 1e-05, %v880_v56 }
 0x830   :  { %2846 = vrsqrt.f32 %v885_v1 }
 0x83a   :  { %v2847_v7 = vpop.eup %2846 }
 0x83b   :  { %v890_v57 = vrot.slane %v2847_v7, %v3047_v21 }
 0x83d   :  { %892 = vrot.lane.b32.xlu1 %v890_v57, %s2883_s18 }
 0x8af   :  { %v893_v51 = vpop.permute.xlu1 %892 }
 0x8b0   :  { %v895_v17 = vmul.f32 %v893_v51, %v881_v52  ;;  %v896_v33 = vmul.f32 %v893_v51, %v882_v50  ;;  %v897_v38 = vmul.f32 %v893_v51, %v883_v31  ;;  %v898_v35 = vmul.f32 %v893_v51, %v884_v4 }
 0x8b2   :  { %v903_v19 = vmul.f32 %v902_v30, %v895_v17  ;;  %v904_v23 = vmul.f32 %v902_v30, %v896_v33  ;;  %v905_v39 = vmul.f32 %v902_v30, %v897_v38  ;;  %v906_v2 = vmul.f32 %v902_v30, %v898_v35 }
 0x8b4   :  { %v911_v41 = vadd.f32 %v910_v3, %v903_v19  ;;  %v912_v42 = vadd.f32 %v910_v3, %v904_v23  ;;  %v913_v54 = vadd.f32 %v910_v3, %v905_v39  ;;  %v914_v55 = vadd.f32 %v910_v3, %v906_v2 }
 0x8b6   :  { %v2752_v0 = vpack.i.bf16 %v912_v42, %v911_v41  ;;  %v923_v56 = vrot.slane %v911_v41, 2  ;;  %v924_v1 = vrot.slane %v912_v42, 2  ;;  %v925_v7 = vrot.slane %v913_v54, 2 }
 0x8b7   :  { %v926_v57 = vrot.slane %v914_v55, 2  ;;  %v916_v62 = vrot.slane %v912_v42, 6  ;;  %v915_v5 = vrot.slane %v911_v41, 6  ;;  %v918_v25 = vrot.slane %v914_v55, 6 }
 0x8b8   :  { %2753 = vrot.lane.b32.xlu0 %v2752_v0, %s2882_s17  ;;  %v928_v58 = vsel %vm660_vm9, %v924_v1, %v925_v7  ;;  %v929_v60 = vsel %vm660_vm9, %v923_v56, %v924_v1  ;;  %v917_v12 = vrot.slane %v913_v54, 6  ;;  %v2767_v34 = vpack.i.bf16 %v914_v55, %v913_v54  ;;  %v3565_v1 = vld [vmem:[%s3968_s2 + $0xc] sm:$0x7] }
 0x8b9   :  { %v2762_v8 = vpack.i.bf16 %v928_v58, %v929_v60  ;;  %v921_v11 = vsel %vm651_vm10, %v915_v5, %v916_v62  ;;  %v927_v27 = vsel %vm660_vm9, %v925_v7, %v926_v57  ;;  %v930_v13 = vsel %vm660_vm9, %v926_v57, %v923_v56 }
 0x8ba   :  { %v922_v14 = vsel %vm651_vm10, %v918_v25, %v915_v5  ;;  %v920_v15 = vsel %vm651_vm10, %v916_v62, %v917_v12  ;;  %v919_v18 = vsel %vm651_vm10, %v917_v12, %v918_v25  ;;  %v2772_v20 = vpack.i.bf16 %v930_v13, %v927_v27 }
 0x8bb   :  { %2763 = vrot.lane.b32.xlu1 %v2762_v8, %s2884_s23  ;;  %v1009_v7 = vrot.slane %v3565_v1, %v3047_v21 }
 0x8bc   :  { %2758 = vrot.lane.b32.xlu0 %v2752_v0, %s2883_s18 }
 0x8bf   :  { %2768 = vrot.lane.b32.xlu1 %v2767_v34, %s2882_s17 }
 0x8c0   :  { %2773 = vrot.lane.b32.xlu0 %v2772_v20, %s2884_s23 }
 0x8c3   :  { %2778 = vrot.lane.b32.xlu1 %v2767_v34, %s2883_s18 }
 0x92a   :  { %v2754_v28 = vpop.permute.xlu0 %2753 }
 0x92b   :  { %v2756_v37 = vunpack.i.h.bf16 %v2754_v28  ;;  %v2755_v24 = vunpack.i.l.bf16 %v2754_v28 }
 0x92d   :  { %v2764_v29 = vpop.permute.xlu1 %2763  ;;  %v976_v52 = vsel %vm170_vm2, %v921_v11, %v2756_v37  ;;  %v975_v4 = vsel %vm170_vm2, %v922_v14, %v2755_v24 }
 0x92e   :  { %v2766_v40 = vunpack.i.h.bf16 %v2764_v29  ;;  %v2765_v30 = vunpack.i.l.bf16 %v2764_v29  ;;  %v2759_v53 = vpop.permute.xlu0 %2758 }
 0x92f   :  { %v2761_v50 = vunpack.i.h.bf16 %v2759_v53  ;;  %v2760_v31 = vunpack.i.l.bf16 %v2759_v53 }
 0x930   :  { %v980_v3 = vsel %vm175_vm3, %v976_v52, %v2766_v40  ;;  %v979_v51 = vsel %vm175_vm3, %v975_v4, %v2765_v30 }
 0x931   :  { %v2769_v17 = vpop.permute.xlu1 %2768  ;;  %v983_v33 = vsel %vm180_vm4, %v979_v51, %v2760_v31  ;;  %v984_v38 = vsel %vm180_vm4, %v980_v3, %v2761_v50 }
 0x932   :  { %v2771_v35 = vunpack.i.h.bf16 %v2769_v17  ;;  %v2770_v22 = vunpack.i.l.bf16 %v2769_v17  ;;  %v2774_v9 = vpop.permute.xlu0 %2773  ;;  %2338 = vmatprep.mubr.f32.mxu1 %v983_v33 }
 0x933   :  { %v2776_v26 = vunpack.i.h.bf16 %v2774_v9  ;;  %v2775_v19 = vunpack.i.l.bf16 %v2774_v9  ;;  %2339 = vmatmul.mubr.f32.vlgmr.msra.gmra.mrb[4].mxu1 %v984_v38 }
 0x934   :  { %v977_v23 = vsel %vm170_vm2, %v920_v15, %v2770_v22  ;;  %v978_v39 = vsel %vm170_vm2, %v919_v18, %v2771_v35 }
 0x935   :  { %v2779_v2 = vpop.permute.xlu1 %2778  ;;  %v981_v54 = vsel %vm175_vm3, %v977_v23, %v2775_v19  ;;  %v982_v55 = vsel %vm175_vm3, %v978_v39, %v2776_v26 }
 0x936   :  { %v2781_v41 = vunpack.i.h.bf16 %v2779_v2  ;;  %v2780_v42 = vunpack.i.l.bf16 %v2779_v2 }
 0x938   :  { %v985_v0 = vsel %vm180_vm4, %v981_v54, %v2780_v42  ;;  %v986_v56 = vsel %vm180_vm4, %v982_v55, %v2781_v41  ;;  %v1185_v54 = vld [vmem:[%s3969_s3] sm:$0xff]  ;;  %v1186_v55 = vld [vmem:[%s3969_s3 + $0x8] sm:$0xff] }
 0x939   :  { %2341 = vmatprep.mubr.f32.mxu1 %v985_v0  ;;  %v2576_v0 = vpack.c.bf16 %v1186_v55, %v1185_v54  ;;  %v2854_v55 = vld [vmem:[%s3966_s0 + $0x8] sm:$0xff] }
 0x93a   :  { %2342 = vmatmul.mubr.f32.gmra.mrb[6].mxu1 %v986_v56  ;;  %v1187_v56 = vld [vmem:[%s3969_s3 + $0x10] sm:$0xff] }
 0x93b   :  { %2577 = vmatprep.subr.bf16.mxu0 %v2576_v0 }
 0x93c   :  { %2579 = vmatpush3.bf16.msra.mxu0 %v2576_v0 }
 0xa06   :  { %v2340_v57 = vpop.f32.mrb[4].mxu1 }
 0xa07   :  { %v1082_v58 = vadd.f32 %v2340_v57, %v1009_v7  ;;  %v1076_v60 = vpop.f32.mrb[5].mxu1 }
 0xa08   :  { %v1077_v62 = vadd.f32 %v1076_v60, %v1009_v7 }
 0xa09   :  { %v1096_v5 = vmax.f32 %v1082_v58, 0.0 }
 0xa0a   :  { %v1095_v8 = vmax.f32 %v1077_v62, 0.0  ;;  %v1168_v62 = vrot.slane %v3565_v1, %v3173_v59 }
 0xa0b   :  { %v3571_v25 = vsel %vm3407_vm11, %v1096_v5, 0.0 }
 0xa0c   :  { %v3575_v11 = vsel %vm3413_vm12, %v1095_v8, 0.0  ;;  %v1104_v12 = vmul.f32 %v3571_v25, %v3571_v25 }
 0xa0d   :  { %v2343_v27 = vpop.f32.mrb[6].mxu1  ;;  %v1103_v13 = vmul.f32 %v3575_v11, %v3575_v11 }
 0xa0e   :  { %v1092_v14 = vadd.f32 %v2343_v27, %v1009_v7  ;;  %1113 = vrot.lane.b32.xlu1 %v1104_v12, %s2882_s17  ;;  %v1086_v15 = vpop.f32.mrb[7].mxu1 }
 0xa0f   :  { %v1087_v18 = vadd.f32 %v1086_v15, %v1009_v7  ;;  %1111 = vrot.lane.b32.xlu0 %v1103_v13, %s2882_s17  ;;  %v1188_v7 = vld [vmem:[%s3969_s3 + $0x18] sm:$0xff]  ;;  %v1176_v13 = vrot.slane %v3565_v1, %v3182_v63 }
 0xa10   :  { %v1098_v61 = vmax.f32 %v1092_v14, 0.0  ;;  %v2580_v57 = vpack.c.bf16 %v1188_v7, %v1187_v56  ;;  %v2855_v56 = vld [vmem:[%s3966_s0] sm:$0xff] }
 0xa11   :  { %v1097_v34 = vmax.f32 %v1087_v18, 0.0 }
 0xa12   :  { %v1102_v6 = vsel %vm3432_vm13, %v1098_v61, 0.0  ;;  %2581 = vmatprep.subr.bf16.mxu0 %v2580_v57 }
 0xa13   :  { %v1101_v20 = vsel %vm3439_vm14, %v1097_v34, 0.0  ;;  %v1106_v28 = vmul.f32 %v1102_v6, %v1102_v6  ;;  %2583 = vmatpush3.bf16.msra.mxu0 %v2580_v57 }
 0xa14   :  { %v1105_v37 = vmul.f32 %v1101_v20, %v1101_v20 }
 0xa15   :  { %1117 = vrot.lane.b32.xlu1 %v1106_v28, %s2882_s17 }
 0xa16   :  { %1115 = vrot.lane.b32.xlu0 %v1105_v37, %s2882_s17 }
 0xa80   :  { %v1114_v24 = vpop.permute.xlu1 %1113 }
 0xa81   :  { %v1112_v29 = vpop.permute.xlu0 %1111  ;;  %v1124_v40 = vsel %vm170_vm2, %v3571_v25, %v1114_v24 }
 0xa82   :  { %v1123_v30 = vsel %vm170_vm2, %v3575_v11, %v1112_v29  ;;  %v1128_v43 = vsel %vm175_vm3, %v1124_v40, 0.0 }
 0xa83   :  { %v1127_v53 = vsel %vm175_vm3, %v1123_v30, 0.0 }
 0xa84   :  { %v1129_v50 = vadd.f32 %v1128_v43, %v1127_v53  ;;  %v2018_v53 = vld [vmem:[%s3967_s1 + $0x200] sm:$0xff] }
 0xa87   :  { %v1118_v16 = vpop.permute.xlu1 %1117 }
 0xa88   :  { %v1116_v52 = vpop.permute.xlu0 %1115  ;;  %v1126_v31 = vsel %vm170_vm2, %v1102_v6, %v1118_v16  ;;  %v2021_v16 = vld [vmem:[%s3967_s1 + $0x218] sm:$0xff] }
 0xa89   :  { %v1125_v4 = vsel %vm170_vm2, %v1101_v20, %v1116_v52  ;;  %v1132_v17 = vsel %vm175_vm3, %v1126_v31, 0.0  ;;  %v2022_v52 = vld [vmem:[%s3967_s1 + $0x220] sm:$0xff] }
 0xa8a   :  { %v1130_v3 = vsel %vm175_vm3, %v1125_v4, 0.0  ;;  %v2024_v4 = vld [vmem:[%s3967_s1 + $0x230] sm:$0xff] }
 0xa8b   :  { %v1131_v51 = vadd.f32 %v1130_v3, %v1129_v50  ;;  %v2023_v50 = vld [vmem:[%s3967_s1 + $0x228] sm:$0xff]  ;;  %v2025_v3 = vld [vmem:[%s3967_s1 + $0x238] sm:$0xff] }
 0xa8c   :  { %v2592_v31 = vpack.c.bf16 %v2023_v50, %v2022_v52 }
 0xa8d   :  { %v1133_v33 = vadd.f32 %v1132_v17, %v1131_v51  ;;  %v2596_v51 = vpack.c.bf16 %v2025_v3, %v2024_v4  ;;  %v2026_v17 = vld [vmem:[%s3967_s1 + $0x240] sm:$0xff] }
 0xa8f   :  { %v1134_v38 = vrot.slane %v1133_v33, 4 }
 0xa91   :  { %v1135_v35 = vadd.f32 %v1134_v38, %v1133_v33  ;;  %v2027_v33 = vld [vmem:[%s3967_s1 + $0x248] sm:$0xff] }
 0xa92   :  { %v2600_v38 = vpack.c.bf16 %v2027_v33, %v2026_v17 }
 0xa93   :  { %v1136_v22 = vrot.slane %v1135_v35, 2 }
 0xa95   :  { %v1137_v9 = vadd.f32 %v1136_v22, %v1135_v35  ;;  %v2028_v35 = vld [vmem:[%s3967_s1 + $0x250] sm:$0xff]  ;;  %v2029_v22 = vld [vmem:[%s3967_s1 + $0x258] sm:$0xff] }
 0xa97   :  { %v1138_v26 = vrot.slane %v1137_v9, 1 }
 0xa99   :  { %v1139_v19 = vadd.f32 %v1138_v26, %v1137_v9  ;;  %v2604_v9 = vpack.c.bf16 %v2029_v22, %v2028_v35  ;;  %v2012_v26 = vld [vmem:[%s3970_s4] ss:$0 sm:$0xff] }
 0xa9b   :  { %v1140_v23 = vmul.f32 0.03125, %v1139_v19  ;;  %v2030_v19 = vld [vmem:[%s3967_s1 + $0x260] sm:$0xff] }
 0xa9d   :  { %v1141_v39 = vmul.f32 %v1140_v23, %v1140_v23  ;;  %v1147_v5 = vsub.f32 %v3575_v11, %v1140_v23  ;;  %v1148_v8 = vsub.f32 %v3571_v25, %v1140_v23  ;;  %v1149_v12 = vsub.f32 %v1101_v20, %v1140_v23 }
 0xa9e   :  { %v1150_v27 = vsub.f32 %v1102_v6, %v1140_v23 }
 0xa9f   :  { %1143 = vrot.lane.b32.xlu0 %v1141_v39, %s2882_s17 }
 0xb11   :  { %v1144_v2 = vpop.permute.xlu0 %1143 }
 0xb12   :  { %v1146_v41 = vsub.f32 %v1140_v23, %v1144_v2  ;;  %v2031_v23 = vld [vmem:[%s3967_s1 + $0x268] sm:$0xff] }
 0xb13   :  { %v2608_v2 = vpack.c.bf16 %v2031_v23, %v2030_v19 }
 0xb14   :  { %v1151_v42 = vadd.f32 1e-05, %v1146_v41 }
 0xb16   :  { %2848 = vrsqrt.f32 %v1151_v42 }
 0xb20   :  { %v2849_v58 = vpop.eup %2848 }
 0xb21   :  { %v1156_v60 = vrot.slane %v2849_v58, %v3047_v21  ;;  %v2032_v58 = vld [vmem:[%s3967_s1 + $0x270] sm:$0xff] }
 0xb23   :  { %1158 = vrot.lane.b32.xlu1 %v1156_v60, %s2883_s18  ;;  %v2033_v60 = vld [vmem:[%s3967_s1 + $0x278] sm:$0xff] }
 0xb95   :  { %v1159_v14 = vpop.permute.xlu1 %1158 }
 0xb96   :  { %v1161_v15 = vmul.f32 %v1159_v14, %v1147_v5  ;;  %v1162_v18 = vmul.f32 %v1159_v14, %v1148_v8  ;;  %v1163_v61 = vmul.f32 %v1159_v14, %v1149_v12  ;;  %v1164_v34 = vmul.f32 %v1159_v14, %v1150_v27 }
 0xb97   :  { %v2612_v8 = vpack.c.bf16 %v2033_v60, %v2032_v58 }
 0xb98   :  { %v1169_v28 = vmul.f32 %v1168_v62, %v1161_v15  ;;  %v1170_v37 = vmul.f32 %v1168_v62, %v1162_v18  ;;  %v1171_v24 = vmul.f32 %v1168_v62, %v1163_v61  ;;  %v1172_v29 = vmul.f32 %v1168_v62, %v1164_v34  ;;  %v2857_v15 = vld [vmem:[%s3966_s0 + $0x10] sm:$0xff] }
 0xb9a   :  { %v1178_v40 = vadd.f32 %v1176_v13, %v1170_v37  ;;  %v1177_v30 = vadd.f32 %v1176_v13, %v1169_v28  ;;  %v1179_v43 = vadd.f32 %v1176_v13, %v1171_v24  ;;  %v1180_v6 = vadd.f32 %v1176_v13, %v1172_v29  ;;  %v2856_v13 = vld [vmem:[%s3966_s0 + $0x18] sm:$0xff] }
 0xb9c   :  { %v1182_v11 = vadd.f32 %v1178_v40, %v3342_v46  ;;  %v1181_v25 = vadd.f32 %v1177_v30, %v3339_v45  ;;  %v1183_v1 = vadd.f32 %v1179_v43, %v3345_v47  ;;  %v1184_v20 = vadd.f32 %v1180_v6, %v3348_v49  ;;  %v2019_v45 = vld [vmem:[%s3967_s1 + $0x208] sm:$0xff]  ;;  %v2020_v46 = vld [vmem:[%s3967_s1 + $0x210] sm:$0xff] }
 0xb9d   :  { %v2584_v47 = vpack.c.bf16 %v2019_v45, %v2018_v53  ;;  %v2588_v49 = vpack.c.bf16 %v2021_v16, %v2020_v46 }
 0xb9e   :  { %2352 = vmatprep.mubr.msk.f32.mxu0 %vm170_vm2, %v1181_v25 }
 0xb9f   :  { %2353 = vmatmul.mubr.msk.f32.vlgmr.msra.gmra.mrb[8].mxu0 %vm170_vm2, %v1182_v11  ;;  %2585 = vmatprep.subr.bf16.mxu1 %v2584_v47 }
 0xba0   :  { %2355 = vmatprep.mubr.msk.f32.mxu0 %vm170_vm2, %v1183_v1  ;;  %2587 = vmatpush3.bf16.msra.mxu1 %v2584_v47 }
 0xba1   :  { %2589 = vmatprep.subr.bf16.mxu1 %v2588_v49 }
 0xba3   :  { %2356 = vmatmul.mubr.msk.f32.gmra.mrb[10].mxu0 %vm170_vm2, %v1184_v20 }
 0xba4   :  { %2591 = vmatpush3.bf16.msra.mxu1 %v2588_v49 }
 0xba5   :  { %2593 = vmatprep.subr.bf16.mxu1 %v2592_v31 }
 0xba8   :  { %2595 = vmatpush3.bf16.msra.mxu1 %v2592_v31 }
 0xba9   :  { %2597 = vmatprep.subr.bf16.mxu1 %v2596_v51 }
 0xbac   :  { %2599 = vmatpush3.bf16.msra.mxu1 %v2596_v51 }
 0xbad   :  { %2601 = vmatprep.subr.bf16.mxu1 %v2600_v38 }
 0xbb0   :  { %2603 = vmatpush3.bf16.msra.mxu1 %v2600_v38 }
 0xbb1   :  { %2605 = vmatprep.subr.bf16.mxu1 %v2604_v9 }
 0xbb4   :  { %2607 = vmatpush3.bf16.msra.mxu1 %v2604_v9 }
 0xbb5   :  { %2609 = vmatprep.subr.bf16.mxu1 %v2608_v2 }
 0xbb8   :  { %2611 = vmatpush3.bf16.msra.mxu1 %v2608_v2 }
 0xbb9   :  { %2613 = vmatprep.subr.bf16.mxu1 %v2612_v8 }
 0xbbc   :  { %2615 = vmatpush3.bf16.msra.mxu1 %v2612_v8 }
 0xc72   :  { %v2354_v39 = vpop.f32.mrb[8].mxu0 }
 0xc73   :  { %v1280_v41 = vadd.f32 %v2354_v39, %v2012_v26  ;;  %v1274_v42 = vpop.f32.mrb[9].mxu0 }
 0xc74   :  { %v1275_v54 = vadd.f32 %v2012_v26, %v1274_v42 }
 0xc75   :  { %v3676_v0 = vadd.f32 %v2854_v55, %v1280_v41 }
 0xc76   :  { %v3681_v7 = vadd.f32 %v2855_v56, %v1275_v54  ;;  %v2357_v57 = vpop.f32.mrb[10].mxu0 }
 0xc77   :  { %v1290_v62 = vadd.f32 %v2357_v57, %v2012_v26  ;;  %v1284_v5 = vpop.f32.mrb[11].mxu0  ;;  %v1306_v34 = vrot.slane %v3676_v0, 1  ;;  %v1298_v1 = vrot.slane %v3676_v0, 7 }
 0xc78   :  { %v1285_v12 = vadd.f32 %v2012_v26, %v1284_v5  ;;  %v2782_v27 = vpack.i.bf16 %v3676_v0, %v3681_v7  ;;  %v1305_v61 = vrot.slane %v3681_v7, 1  ;;  %v1297_v20 = vrot.slane %v3681_v7, 7 }
 0xc79   :  { %v3694_v14 = vadd.f32 %v2856_v13, %v1290_v62 }
 0xc7a   :  { %v3699_v18 = vadd.f32 %v2857_v15, %v1285_v12  ;;  %2783 = vrot.lane.b32.xlu0 %v2782_v27, %s2882_s17  ;;  %v1311_v40 = vsel %vm121_vm0, %v1305_v61, %v1306_v34  ;;  %v1303_v16 = vsel %vm112_vm1, %v1297_v20, %v1298_v1 }
 0xc7b   :  { %v1308_v28 = vrot.slane %v3694_v14, 1  ;;  %v1300_v53 = vrot.slane %v3694_v14, 7 }
 0xc7c   :  { %v1307_v37 = vrot.slane %v3699_v18, 1  ;;  %v2797_v25 = vpack.i.bf16 %v3694_v14, %v3699_v18  ;;  %v1299_v4 = vrot.slane %v3699_v18, 7 }
 0xc7d   :  { %v1312_v24 = vsel %vm121_vm0, %v1308_v28, %v1305_v61  ;;  %v1304_v31 = vsel %vm112_vm1, %v1300_v53, %v1297_v20 }
 0xc7e   :  { %2788 = vrot.lane.b32.xlu0 %v2782_v27, %s2883_s18  ;;  %v1310_v29 = vsel %vm121_vm0, %v1306_v34, %v1307_v37  ;;  %v1309_v30 = vsel %vm121_vm0, %v1307_v37, %v1308_v28  ;;  %v1302_v2 = vsel %vm112_vm1, %v1298_v1, %v1299_v4  ;;  %v1301_v41 = vsel %vm112_vm1, %v1299_v4, %v1300_v53  ;;  %v3748_v27 = vld [vmem:[%s3968_s2 + $0x10] sm:$0x7] }
 0xc7f   :  { %v2792_v43 = vpack.i.bf16 %v1310_v29, %v1311_v40  ;;  %v2802_v11 = vpack.i.bf16 %v1312_v24, %v1309_v30  ;;  %v1391_v13 = vrot.slane %v3748_v27, %v3047_v21 }
 0xc81   :  { %2793 = vrot.lane.b32.xlu1 %v2792_v43, %s2884_s23 }
 0xc82   :  { %2803 = vrot.lane.b32.xlu0 %v2802_v11, %s2884_s23 }
 0xc85   :  { %2798 = vrot.lane.b32.xlu1 %v2797_v25, %s2882_s17 }
 0xc89   :  { %2808 = vrot.lane.b32.xlu1 %v2797_v25, %s2883_s18 }
 0xcec   :  { %v2784_v6 = vpop.permute.xlu0 %2783 }
 0xced   :  { %v2786_v45 = vunpack.i.h.bf16 %v2784_v6  ;;  %v2785_v46 = vunpack.i.l.bf16 %v2784_v6 }
 0xcef   :  { %v1358_v3 = vsel %vm170_vm2, %v1303_v16, %v2786_v45  ;;  %v1357_v33 = vsel %vm170_vm2, %v1304_v31, %v2785_v46 }
 0xcf0   :  { %v2789_v47 = vpop.permute.xlu0 %2788 }
 0xcf1   :  { %v2791_v51 = vunpack.i.h.bf16 %v2789_v47  ;;  %v2790_v17 = vunpack.i.l.bf16 %v2789_v47 }
 0xcf3   :  { %v2794_v49 = vpop.permute.xlu1 %2793 }
 0xcf4   :  { %v2796_v52 = vunpack.i.h.bf16 %v2794_v49  ;;  %v2795_v50 = vunpack.i.l.bf16 %v2794_v49  ;;  %v2804_v19 = vpop.permute.xlu0 %2803 }
 0xcf5   :  { %v2806_v55 = vunpack.i.h.bf16 %v2804_v19  ;;  %v2805_v56 = vunpack.i.l.bf16 %v2804_v19 }
 0xcf6   :  { %v1362_v38 = vsel %vm175_vm3, %v1358_v3, %v2796_v52  ;;  %v1361_v35 = vsel %vm175_vm3, %v1357_v33, %v2795_v50 }
 0xcf7   :  { %v2799_v22 = vpop.permute.xlu1 %2798  ;;  %v1365_v9 = vsel %vm180_vm4, %v1361_v35, %v2790_v17  ;;  %v1366_v26 = vsel %vm180_vm4, %v1362_v38, %v2791_v51 }
 0xcf8   :  { %v2801_v23 = vunpack.i.h.bf16 %v2799_v22  ;;  %v2800_v39 = vunpack.i.l.bf16 %v2799_v22  ;;  %2390 = vmatprep.mubr.f32.mxu1 %v1365_v9 }
 0xcf9   :  { %2391 = vmatmul.mubr.f32.vlgmr.msra.gmra.mrb[8].mxu1 %v1366_v26 }
 0xcfa   :  { %v1359_v42 = vsel %vm170_vm2, %v1302_v2, %v2800_v39  ;;  %v1360_v54 = vsel %vm170_vm2, %v1301_v41, %v2801_v23 }
 0xcfb   :  { %v2809_v57 = vpop.permute.xlu1 %2808  ;;  %v1363_v62 = vsel %vm175_vm3, %v1359_v42, %v2805_v56  ;;  %v1364_v5 = vsel %vm175_vm3, %v1360_v54, %v2806_v55 }
 0xcfc   :  { %v2811_v58 = vunpack.i.h.bf16 %v2809_v57  ;;  %v2810_v60 = vunpack.i.l.bf16 %v2809_v57 }
 0xcfe   :  { %v1367_v8 = vsel %vm180_vm4, %v1363_v62, %v2810_v60  ;;  %v1368_v12 = vsel %vm180_vm4, %v1364_v5, %v2811_v58 }
 0xcff   :  { %2393 = vmatprep.mubr.f32.mxu1 %v1367_v8  ;;  %v2035_v8 = vld [vmem:[%s3967_s1 + $0x280] sm:$0xff] }
 0xd00   :  { %2394 = vmatmul.mubr.f32.gmra.mrb[10].mxu1 %v1368_v12  ;;  %v2036_v12 = vld [vmem:[%s3967_s1 + $0x288] sm:$0xff] }
 0xdcc   :  { %v2392_v15 = vpop.f32.mrb[8].mxu1 }
 0xdcd   :  { %v1464_v61 = vadd.f32 %v2392_v15, %v1391_v13  ;;  %v1458_v34 = vpop.f32.mrb[9].mxu1  ;;  %v2616_v15 = vpack.c.bf16 %v2036_v12, %v2035_v8 }
 0xdce   :  { %v1459_v28 = vadd.f32 %v1458_v34, %v1391_v13 }
 0xdcf   :  { %v1478_v37 = vmax.f32 %v1464_v61, 0.0  ;;  %v2038_v61 = vld [vmem:[%s3967_s1 + $0x298] sm:$0xff]  ;;  %2617 = vmatprep.subr.bf16.mxu0 %v2616_v15 }
 0xdd0   :  { %v1477_v24 = vmax.f32 %v1459_v28, 0.0  ;;  %v2039_v28 = vld [vmem:[%s3967_s1 + $0x2a0] sm:$0xff]  ;;  %2619 = vmatpush3.bf16.msra.mxu0 %v2616_v15 }
 0xdd1   :  { %v3754_v29 = vsel %vm3069_vm5, %v1478_v37, 0.0  ;;  %v2040_v37 = vld [vmem:[%s3967_s1 + $0x2a8] sm:$0xff] }
 0xdd2   :  { %v3758_v40 = vsel %vm3076_vm6, %v1477_v24, 0.0  ;;  %v1486_v30 = vmul.f32 %v3754_v29, %v3754_v29  ;;  %v2624_v24 = vpack.c.bf16 %v2040_v37, %v2039_v28 }
 0xdd3   :  { %v2395_v43 = vpop.f32.mrb[10].mxu1  ;;  %v1485_v11 = vmul.f32 %v3758_v40, %v3758_v40 }
 0xdd4   :  { %v1474_v25 = vadd.f32 %v2395_v43, %v1391_v13  ;;  %1495 = vrot.lane.b32.xlu1 %v1486_v30, %s2882_s17  ;;  %v1468_v6 = vpop.f32.mrb[11].mxu1  ;;  %v2041_v30 = vld [vmem:[%s3967_s1 + $0x2b0] sm:$0xff]  ;;  %v2042_v43 = vld [vmem:[%s3967_s1 + $0x2b8] sm:$0xff] }
 0xdd5   :  { %v1469_v1 = vadd.f32 %v1468_v6, %v1391_v13  ;;  %1493 = vrot.lane.b32.xlu0 %v1485_v11, %s2882_s17  ;;  %v2037_v13 = vld [vmem:[%s3967_s1 + $0x290] sm:$0xff]  ;;  %v2628_v11 = vpack.c.bf16 %v2042_v43, %v2041_v30  ;;  %v2044_v6 = vld [vmem:[%s3967_s1 + $0x2c8] sm:$0xff] }
 0xdd6   :  { %v1480_v20 = vmax.f32 %v1474_v25, 0.0  ;;  %v2620_v34 = vpack.c.bf16 %v2038_v61, %v2037_v13  ;;  %v2043_v25 = vld [vmem:[%s3967_s1 + $0x2c0] sm:$0xff] }
 0xdd7   :  { %v1479_v53 = vmax.f32 %v1469_v1, 0.0  ;;  %v2632_v1 = vpack.c.bf16 %v2044_v6, %v2043_v25 }
 0xdd8   :  { %v3768_v45 = vsel %vm3091_vm7, %v1480_v20, 0.0  ;;  %2621 = vmatprep.subr.bf16.mxu0 %v2620_v34  ;;  %v2045_v20 = vld [vmem:[%s3967_s1 + $0x2d0] sm:$0xff] }
 0xdd9   :  { %v3772_v46 = vsel %vm3099_vm8, %v1479_v53, 0.0  ;;  %v1488_v47 = vmul.f32 %v3768_v45, %v3768_v45  ;;  %2623 = vmatpush3.bf16.msra.mxu0 %v2620_v34  ;;  %v2046_v53 = vld [vmem:[%s3967_s1 + $0x2d8] sm:$0xff] }
 0xdda   :  { %v1487_v16 = vmul.f32 %v3772_v46, %v3772_v46  ;;  %2625 = vmatprep.subr.bf16.mxu0 %v2624_v24 }
 0xddb   :  { %1499 = vrot.lane.b32.xlu1 %v1488_v47, %s2882_s17  ;;  %v2636_v47 = vpack.c.bf16 %v2046_v53, %v2045_v20 }
 0xddc   :  { %1497 = vrot.lane.b32.xlu0 %v1487_v16, %s2882_s17  ;;  %v2047_v16 = vld [vmem:[%s3967_s1 + $0x2e0] sm:$0xff] }
 0xddd   :  { %2627 = vmatpush3.bf16.msra.mxu0 %v2624_v24 }
 0xdde   :  { %2629 = vmatprep.subr.bf16.mxu0 %v2628_v11 }
 0xde1   :  { %2631 = vmatpush3.bf16.msra.mxu0 %v2628_v11 }
 0xde2   :  { %2633 = vmatprep.subr.bf16.mxu0 %v2632_v1 }
 0xde5   :  { %2635 = vmatpush3.bf16.msra.mxu0 %v2632_v1 }
 0xde6   :  { %2637 = vmatprep.subr.bf16.mxu0 %v2636_v47 }
 0xde9   :  { %2639 = vmatpush3.bf16.msra.mxu0 %v2636_v47 }
 0xe46   :  { %v1496_v49 = vpop.permute.xlu1 %1495 }
 0xe47   :  { %v1494_v52 = vpop.permute.xlu0 %1493  ;;  %v1506_v50 = vsel %vm170_vm2, %v3754_v29, %v1496_v49  ;;  %v2048_v49 = vld [vmem:[%s3967_s1 + $0x2e8] sm:$0xff] }
 0xe48   :  { %v1505_v31 = vsel %vm170_vm2, %v3758_v40, %v1494_v52  ;;  %v1510_v4 = vsel %vm175_vm3, %v1506_v50, 0.0  ;;  %v1550_v52 = vrot.slane %v3748_v27, %v3173_v59  ;;  %v2640_v50 = vpack.c.bf16 %v2048_v49, %v2047_v16 }
 0xe49   :  { %v1509_v3 = vsel %vm175_vm3, %v1505_v31, 0.0 }
 0xe4a   :  { %v1511_v33 = vadd.f32 %v1510_v4, %v1509_v3  ;;  %2641 = vmatprep.subr.bf16.mxu0 %v2640_v50 }
 0xe4b   :  { %2643 = vmatpush3.bf16.msra.mxu0 %v2640_v50 }
 0xe4d   :  { %v1500_v51 = vpop.permute.xlu1 %1499 }
 0xe4e   :  { %v1498_v17 = vpop.permute.xlu0 %1497  ;;  %v1508_v38 = vsel %vm170_vm2, %v3768_v45, %v1500_v51 }
 0xe4f   :  { %v1507_v35 = vsel %vm170_vm2, %v3772_v46, %v1498_v17  ;;  %v1514_v26 = vsel %vm175_vm3, %v1508_v38, 0.0  ;;  %v1558_v17 = vrot.slane %v3748_v27, %v3182_v63 }
 0xe50   :  { %v1512_v22 = vsel %vm175_vm3, %v1507_v35, 0.0 }
 0xe51   :  { %v1513_v9 = vadd.f32 %v1512_v22, %v1511_v33 }
 0xe53   :  { %v1515_v19 = vadd.f32 %v1514_v26, %v1513_v9 }
 0xe55   :  { %v1516_v23 = vrot.slane %v1515_v19, 4 }
 0xe57   :  { %v1517_v39 = vadd.f32 %v1516_v23, %v1515_v19 }
 0xe59   :  { %v1518_v2 = vrot.slane %v1517_v39, 2 }
 0xe5b   :  { %v1519_v41 = vadd.f32 %v1518_v2, %v1517_v39 }
 0xe5d   :  { %v1520_v42 = vrot.slane %v1519_v41, 1 }
 0xe5f   :  { %v1521_v54 = vadd.f32 %v1520_v42, %v1519_v41 }
 0xe61   :  { %v1522_v55 = vmul.f32 0.03125, %v1521_v54 }
 0xe63   :  { %v1523_v56 = vmul.f32 %v1522_v55, %v1522_v55  ;;  %v1529_v31 = vsub.f32 %v3758_v40, %v1522_v55  ;;  %v1530_v4 = vsub.f32 %v3754_v29, %v1522_v55  ;;  %v1531_v3 = vsub.f32 %v3772_v46, %v1522_v55  ;;  %v2049_v40 = vld [vmem:[%s3967_s1 + $0x2f0] sm:$0xff]  ;;  %v2050_v29 = vld [vmem:[%s3967_s1 + $0x2f8] sm:$0xff] }
 0xe64   :  { %v1532_v51 = vsub.f32 %v3768_v45, %v1522_v55  ;;  %v2644_v46 = vpack.c.bf16 %v2050_v29, %v2049_v40 }
 0xe65   :  { %1525 = vrot.lane.b32.xlu0 %v1523_v56, %s2882_s17 }
 0xe66   :  { %2645 = vmatprep.subr.bf16.mxu0 %v2644_v46 }
 0xe67   :  { %2647 = vmatpush3.bf16.msra.mxu0 %v2644_v46 }
 0xed7   :  { %v1526_v57 = vpop.permute.xlu0 %1525 }
 0xed8   :  { %v1528_v58 = vsub.f32 %v1522_v55, %v1526_v57 }
 0xeda   :  { %v1533_v60 = vadd.f32 1e-05, %v1528_v58 }
 0xedc   :  { %2850 = vrsqrt.f32 %v1533_v60 }
 0xee6   :  { %v2851_v62 = vpop.eup %2850 }
 0xee7   :  { %v1538_v5 = vrot.slane %v2851_v62, %v3047_v21 }
 0xee9   :  { %1540 = vrot.lane.b32.xlu1 %v1538_v5, %s2883_s18 }
 0xf5b   :  { %v1541_v33 = vpop.permute.xlu1 %1540 }
 0xf5c   :  { %v1543_v38 = vmul.f32 %v1541_v33, %v1529_v31  ;;  %v1544_v35 = vmul.f32 %v1541_v33, %v1530_v4  ;;  %v1545_v22 = vmul.f32 %v1541_v33, %v1531_v3  ;;  %v1546_v9 = vmul.f32 %v1541_v33, %v1532_v51 }
 0xf5e   :  { %v1551_v45 = vmul.f32 %v1550_v52, %v1543_v38  ;;  %v1552_v26 = vmul.f32 %v1550_v52, %v1544_v35  ;;  %v1553_v19 = vmul.f32 %v1550_v52, %v1545_v22  ;;  %v1554_v27 = vmul.f32 %v1550_v52, %v1546_v9 }
 0xf60   :  { %v1559_v23 = vadd.f32 %v1558_v17, %v1551_v45  ;;  %v1560_v39 = vadd.f32 %v1558_v17, %v1552_v26  ;;  %v1561_v2 = vadd.f32 %v1558_v17, %v1553_v19  ;;  %v1562_v41 = vadd.f32 %v1558_v17, %v1554_v27 }
 0xf62   :  { %v2812_v42 = vpack.i.bf16 %v1560_v39, %v1559_v23  ;;  %v1571_v54 = vrot.slane %v1559_v23, 1  ;;  %v1572_v55 = vrot.slane %v1560_v39, 1  ;;  %v1573_v56 = vrot.slane %v1561_v2, 1 }
 0xf63   :  { %v1574_v57 = vrot.slane %v1562_v41, 1  ;;  %v1564_v62 = vrot.slane %v1560_v39, 7  ;;  %v1563_v5 = vrot.slane %v1559_v23, 7  ;;  %v1566_v12 = vrot.slane %v1562_v41, 7  ;;  %v3888_v39 = vld [vmem:[%s3968_s2 + $0x14] sm:$0x7] }
 0xf64   :  { %2813 = vrot.lane.b32.xlu0 %v2812_v42, %s2882_s17  ;;  %v1576_v58 = vsel %vm121_vm0, %v1572_v55, %v1573_v56  ;;  %v1577_v60 = vsel %vm121_vm0, %v1571_v54, %v1572_v55  ;;  %v1565_v15 = vrot.slane %v1561_v2, 7  ;;  %v2827_v30 = vpack.i.bf16 %v1562_v41, %v1561_v2 }
 0xf65   :  { %v2822_v8 = vpack.i.bf16 %v1576_v58, %v1577_v60  ;;  %v1569_v13 = vsel %vm112_vm1, %v1563_v5, %v1564_v62  ;;  %v1575_v61 = vsel %vm121_vm0, %v1573_v56, %v1574_v57  ;;  %v1578_v34 = vsel %vm121_vm0, %v1574_v57, %v1571_v54 }
 0xf66   :  { %v1570_v28 = vsel %vm112_vm1, %v1566_v12, %v1563_v5  ;;  %v1568_v37 = vsel %vm112_vm1, %v1564_v62, %v1565_v15  ;;  %v1567_v24 = vsel %vm112_vm1, %v1565_v15, %v1566_v12  ;;  %v2832_v43 = vpack.i.bf16 %v1578_v34, %v1575_v61 }
 0xf67   :  { %2823 = vrot.lane.b32.xlu1 %v2822_v8, %s2884_s23  ;;  %v1657_v2 = vrot.slane %v3888_v39, %v3047_v21 }
 0xf68   :  { %2818 = vrot.lane.b32.xlu0 %v2812_v42, %s2883_s18 }
 0xf6b   :  { %2828 = vrot.lane.b32.xlu1 %v2827_v30, %s2882_s17 }
 0xf6c   :  { %2833 = vrot.lane.b32.xlu0 %v2832_v43, %s2884_s23 }
 0xf6f   :  { %2838 = vrot.lane.b32.xlu1 %v2827_v30, %s2883_s18 }
 0xfd6   :  { %v2814_v11 = vpop.permute.xlu0 %2813 }
 0xfd7   :  { %v2816_v25 = vunpack.i.h.bf16 %v2814_v11  ;;  %v2815_v6 = vunpack.i.l.bf16 %v2814_v11 }
 0xfd9   :  { %v2824_v1 = vpop.permute.xlu1 %2823  ;;  %v1624_v16 = vsel %vm170_vm2, %v1569_v13, %v2816_v25  ;;  %v1623_v52 = vsel %vm170_vm2, %v1570_v28, %v2815_v6 }
 0xfda   :  { %v2826_v20 = vunpack.i.h.bf16 %v2824_v1  ;;  %v2825_v53 = vunpack.i.l.bf16 %v2824_v1  ;;  %v2819_v47 = vpop.permute.xlu0 %2818 }
 0xfdb   :  { %v2821_v49 = vunpack.i.h.bf16 %v2819_v47  ;;  %v2820_v10 = vunpack.i.l.bf16 %v2819_v47 }
 0xfdc   :  { %v1628_v50 = vsel %vm175_vm3, %v1624_v16, %v2826_v20  ;;  %v1627_v31 = vsel %vm175_vm3, %v1623_v52, %v2825_v53 }
 0xfdd   :  { %v2829_v4 = vpop.permute.xlu1 %2828  ;;  %v1631_v3 = vsel %vm180_vm4, %v1627_v31, %v2820_v10  ;;  %v1632_v51 = vsel %vm180_vm4, %v1628_v50, %v2821_v49 }
 0xfde   :  { %v2831_v17 = vunpack.i.h.bf16 %v2829_v4  ;;  %v2830_v33 = vunpack.i.l.bf16 %v2829_v4  ;;  %v2834_v38 = vpop.permute.xlu0 %2833  ;;  %2428 = vmatprep.mubr.f32.mxu0 %v1631_v3 }
 0xfdf   :  { %v2836_v35 = vunpack.i.h.bf16 %v2834_v38  ;;  %v2835_v22 = vunpack.i.l.bf16 %v2834_v38  ;;  %2429 = vmatmul.mubr.f32.vlgmr.msra.gmra.mrb[12].mxu0 %v1632_v51 }
 0xfe0   :  { %v1625_v9 = vsel %vm170_vm2, %v1568_v37, %v2830_v33  ;;  %v1626_v40 = vsel %vm170_vm2, %v1567_v24, %v2831_v17 }
 0xfe1   :  { %v2839_v29 = vpop.permute.xlu1 %2838  ;;  %v1629_v26 = vsel %vm175_vm3, %v1625_v9, %v2835_v22  ;;  %v1630_v19 = vsel %vm175_vm3, %v1626_v40, %v2836_v35  ;;  %v1833_v9 = vld [vmem:[%s3971_s5] sm:$0xff]  ;;  %v1834_v40 = vld [vmem:[%s3971_s5 + $0x8] sm:$0xff] }
 0xfe2   :  { %v2841_v46 = vunpack.i.h.bf16 %v2839_v29  ;;  %v2840_v45 = vunpack.i.l.bf16 %v2839_v29  ;;  %v2648_v29 = vpack.c.bf16 %v1834_v40, %v1833_v9 }
 0xfe4   :  { %v1633_v27 = vsel %vm180_vm4, %v1629_v26, %v2840_v45  ;;  %v1634_v23 = vsel %vm180_vm4, %v1630_v19, %v2841_v46  ;;  %2649 = vmatprep.subr.bf16.mxu1 %v2648_v29  ;;  %v1835_v46 = vld [vmem:[%s3971_s5 + $0x10] sm:$0xff]  ;;  %v1836_v45 = vld [vmem:[%s3971_s5 + $0x18] sm:$0xff] }
 0xfe5   :  { %2431 = vmatprep.mubr.f32.mxu0 %v1633_v27  ;;  %2651 = vmatpush3.bf16.msra.mxu1 %v2648_v29  ;;  %v2652_v26 = vpack.c.bf16 %v1836_v45, %v1835_v46 }
 0xfe6   :  { %2432 = vmatmul.mubr.f32.gmra.mrb[14].mxu0 %v1634_v23  ;;  %v1816_v23 = vrot.slane %v3888_v39, %v3173_v59 }
 0xfe7   :  { %2653 = vmatprep.subr.bf16.mxu1 %v2652_v26 }
 0xfe9   :  { %2655 = vmatpush3.bf16.msra.mxu1 %v2652_v26 }
0x10b2   :  { %v2430_v41 = vpop.f32.mrb[12].mxu0 }
0x10b3   :  { %v1730_v42 = vadd.f32 %v2430_v41, %v1657_v2  ;;  %v1724_v54 = vpop.f32.mrb[13].mxu0 }
0x10b4   :  { %v1725_v55 = vadd.f32 %v1724_v54, %v1657_v2 }
0x10b5   :  { %v1744_v56 = vmax.f32 %v1730_v42, 0.0 }
0x10b6   :  { %v1743_v57 = vmax.f32 %v1725_v55, 0.0  ;;  %v1824_v55 = vrot.slane %v3888_v39, %v3182_v63 }
0x10b7   :  { %v3894_v58 = vsel %vm3069_vm5, %v1744_v56, 0.0 }
0x10b8   :  { %v3898_v60 = vsel %vm3076_vm6, %v1743_v57, 0.0  ;;  %v1752_v62 = vmul.f32 %v3894_v58, %v3894_v58 }
0x10b9   :  { %v2433_v5 = vpop.f32.mrb[14].mxu0  ;;  %v1751_v8 = vmul.f32 %v3898_v60, %v3898_v60 }
0x10ba   :  { %v1740_v12 = vadd.f32 %v2433_v5, %v1657_v2  ;;  %1761 = vrot.lane.b32.xlu1 %v1752_v62, %s2882_s17  ;;  %v1734_v13 = vpop.f32.mrb[15].mxu0 }
0x10bb   :  { %v1735_v15 = vadd.f32 %v1734_v13, %v1657_v2  ;;  %1759 = vrot.lane.b32.xlu0 %v1751_v8, %s2882_s17 }
0x10bc   :  { %v1746_v32 = vmax.f32 %v1740_v12, 0.0 }
0x10bd   :  { %v1745_v61 = vmax.f32 %v1735_v15, 0.0 }
0x10be   :  { %v1750_v36 = vsel %vm3091_vm7, %v1746_v32, 0.0 }
0x10bf   :  { %v1749_v34 = vsel %vm3099_vm8, %v1745_v61, 0.0  ;;  %v1754_v28 = vmul.f32 %v1750_v36, %v1750_v36 }
0x10c0   :  { %v1753_v37 = vmul.f32 %v1749_v34, %v1749_v34 }
0x10c1   :  { %1765 = vrot.lane.b32.xlu1 %v1754_v28, %s2882_s17 }
0x10c2   :  { %1763 = vrot.lane.b32.xlu0 %v1753_v37, %s2882_s17 }
0x112c   :  { %v1762_v24 = vpop.permute.xlu1 %1761 }
0x112d   :  { %v1760_v30 = vpop.permute.xlu0 %1759  ;;  %v1772_v43 = vsel %vm170_vm2, %v3894_v58, %v1762_v24 }
0x112e   :  { %v1771_v11 = vsel %vm170_vm2, %v3898_v60, %v1760_v30  ;;  %v1776_v44 = vsel %vm175_vm3, %v1772_v43, 0.0 }
0x112f   :  { %v1775_v25 = vsel %vm175_vm3, %v1771_v11, 0.0 }
0x1130   :  { %v1777_v1 = vadd.f32 %v1776_v44, %v1775_v25 }
0x1133   :  { %v1766_v48 = vpop.permute.xlu1 %1765 }
0x1134   :  { %v1764_v6 = vpop.permute.xlu0 %1763  ;;  %v1774_v20 = vsel %vm170_vm2, %v1750_v36, %v1766_v48 }
0x1135   :  { %v1773_v53 = vsel %vm170_vm2, %v1749_v34, %v1764_v6  ;;  %v1780_v49 = vsel %vm175_vm3, %v1774_v20, 0.0 }
0x1136   :  { %v1778_v47 = vsel %vm175_vm3, %v1773_v53, 0.0 }
0x1137   :  { %v1779_v16 = vadd.f32 %v1778_v47, %v1777_v1 }
0x1139   :  { %v1781_v10 = vadd.f32 %v1780_v49, %v1779_v16 }
0x113b   :  { %v1782_v52 = vrot.slane %v1781_v10, 4 }
0x113d   :  { %v1783_v50 = vadd.f32 %v1782_v52, %v1781_v10 }
0x113f   :  { %v1784_v31 = vrot.slane %v1783_v50, 2 }
0x1141   :  { %v1785_v4 = vadd.f32 %v1784_v31, %v1783_v50 }
0x1143   :  { %v1786_v3 = vrot.slane %v1785_v4, 1 }
0x1145   :  { %v1787_v51 = vadd.f32 %v1786_v3, %v1785_v4 }
0x1147   :  { %v1788_v17 = vmul.f32 0.03125, %v1787_v51 }
0x1149   :  { %v1789_v33 = vmul.f32 %v1788_v17, %v1788_v17  ;;  %v1795_v2 = vsub.f32 %v3898_v60, %v1788_v17  ;;  %v1796_v41 = vsub.f32 %v3894_v58, %v1788_v17  ;;  %v1797_v42 = vsub.f32 %v1749_v34, %v1788_v17  ;;  %v2051_v34 = vld [vmem:[%s3972_s6] ss:$0 sm:$0xff] }
0x114a   :  { %v1798_v54 = vsub.f32 %v1750_v36, %v1788_v17 }
0x114b   :  { %1791 = vrot.lane.b32.xlu0 %v1789_v33, %s2882_s17 }
0x11bd   :  { %v1792_v38 = vpop.permute.xlu0 %1791 }
0x11be   :  { %v1794_v35 = vsub.f32 %v1788_v17, %v1792_v38 }
0x11c0   :  { %v1799_v22 = vadd.f32 1e-05, %v1794_v35 }
0x11c2   :  { %2852 = vrsqrt.f32 %v1799_v22 }
0x11cc   :  { %v2853_v19 = vpop.eup %2852 }
0x11cd   :  { %v1804_v27 = vrot.slane %v2853_v19, %v3047_v21 }
0x11cf   :  { %1806 = vrot.lane.b32.xlu1 %v1804_v27, %s2883_s18 }
0x1241   :  { %v1807_v56 = vpop.permute.xlu1 %1806 }
0x1242   :  { %v1809_v57 = vmul.f32 %v1807_v56, %v1795_v2  ;;  %v1810_v62 = vmul.f32 %v1807_v56, %v1796_v41  ;;  %v1811_v5 = vmul.f32 %v1807_v56, %v1797_v42  ;;  %v1812_v8 = vmul.f32 %v1807_v56, %v1798_v54 }
0x1244   :  { %v1817_v21 = vmul.f32 %v1816_v23, %v1809_v57  ;;  %v1818_v12 = vmul.f32 %v1816_v23, %v1810_v62  ;;  %v1819_v13 = vmul.f32 %v1816_v23, %v1811_v5  ;;  %v1820_v15 = vmul.f32 %v1816_v23, %v1812_v8 }
0x1246   :  { %v1825_v32 = vadd.f32 %v1824_v55, %v1817_v21  ;;  %v1826_v59 = vadd.f32 %v1824_v55, %v1818_v12  ;;  %v1827_v61 = vadd.f32 %v1824_v55, %v1819_v13  ;;  %v1828_v36 = vadd.f32 %v1824_v55, %v1820_v15 }
0x1248   :  { %v1830_v60 = vadd.f32 %v1826_v59, %v3676_v0  ;;  %v1829_v58 = vadd.f32 %v1825_v32, %v3681_v7  ;;  %v1831_v63 = vadd.f32 %v1827_v61, %v3699_v18  ;;  %v1832_v39 = vadd.f32 %v1828_v36, %v3694_v14 }
0x124a   :  { %2442 = vmatprep.mubr.msk.f32.mxu1 %vm170_vm2, %v1829_v58 }
0x124b   :  { %2443 = vmatmul.mubr.msk.f32.vlgmr.msra.gmra.mrb[12].mxu1 %vm170_vm2, %v1830_v60 }
0x124c   :  { %2445 = vmatprep.mubr.msk.f32.mxu1 %vm170_vm2, %v1831_v63 }
0x124f   :  { %2446 = vmatmul.mubr.msk.f32.gmra.mrb[14].mxu1 %vm170_vm2, %v1832_v39 }
0x131e   :  { %v2444_v0 = vpop.f32.mrb[12].mxu1 }
0x131f   :  { %v1928_v28 = vadd.f32 %v2444_v0, %v2051_v34  ;;  %v1922_v7 = vpop.f32.mrb[13].mxu1 }
0x1320   :  { %v1923_v37 = vadd.f32 %v2051_v34, %v1922_v7 }
0x1321   :  { %1942 = vst [vmem:[#allocation2 + $0x8] sm:$0xff] %v1928_v28 }
0x1322   :  { %1941 = vst [vmem:[#allocation2] sm:$0xff] %v1923_v37  ;;  %v2447_v18 = vpop.f32.mrb[14].mxu1 }
0x1323   :  { %v1938_v24 = vadd.f32 %v2447_v18, %v2051_v34  ;;  %v1932_v30 = vpop.f32.mrb[15].mxu1 }
0x1324   :  { %v1933_v43 = vadd.f32 %v2051_v34, %v1932_v30 }
0x1325   :  { %1944 = vst [vmem:[#allocation2 + $0x18] sm:$0xff] %v1938_v24 }
0x1326   :  { %1943 = vst [vmem:[#allocation2 + $0x10] sm:$0xff] %v1933_v43 }
0x1327   :  { %2869 = shalt.err (!%p2866_p4)
}
0x1328   :  { %s2870_s10 = scalar_lea.hbm %s3973_s7, 512 }
0x1329   :  { %p2871_p5 = scmp.ne.s32.totalorder %s3973_s7, %s2870_s10  ;;  %p2874_p6 = scmp.lt.u32.totalorder %s2870_s10, %s3973_s7 }
0x132b   :  { %p2876_p7 = pnand %p2874_p6, %p2871_p5 }
0x132d   :  { %2879 = shalt.err (!%p2876_p7)
}
0x132e   :  { %s2886_s13 = smov 128   ;;  %s2887_s14 = smov 8  }
0x132f   :  { %1956 = dma.vmem_to_hbm [thread:$0]  %s1951_s30, 512, %s3973_s7, [#allocation3], %s2886_s13, %s2886_s13, %s2887_s14  }
0x1330   :  { %2880 = dma.done.wait [#allocation3], 512  }
0x1331   :  { %2881 = vsyncadd [#allocation3], 4294966784 }
0x1332   :  { %1960 = vsyncpa [#allocation3], 1 }

</bundles_post_ra>
